<compile_context>
chip_gen: v7x
topology: tpu7x:2x2x1
jax: 0.10.0
libtpu: 0.0.40
codegen_flags: <defaults>
</compile_context>

<pallas_src>
import jax
import jax.numpy as jnp
from jax.experimental import pallas as pl
from jax.experimental.pallas import tpu as pltpu

LANE = 128
SUBLANE = 16  # bf16 sublane packing


def _round_up(x, m):
    return ((x + m - 1) // m) * m


# ---------------------------------------------------------------------------
# Kernel
# ---------------------------------------------------------------------------
def make_brain_kernel(num_agg_layers, n_sel, sel_depth, sel_col_offsets,
                      sel_col_widths, compute_dtype):
    """Aggregator MLP (Linear+SiLU) then per-selector Linear stacks."""

    def kernel(*refs):
        idx = 0
        x_ref = refs[idx]
        idx += 1
        agg = []
        for _ in range(num_agg_layers):
            agg.append((refs[idx], refs[idx + 1]))
            idx += 2
        sel = []
        for _ in range(n_sel):
            layers = []
            for _ in range(sel_depth):
                layers.append((refs[idx], refs[idx + 1]))
                idx += 2
            sel.append(layers)
        out_ref = refs[idx]

        # Feature aggregator: Linear -> SiLU per layer (bf16 MXU matmul,
        # f32 accumulate, sigmoid on the EUP).
        h = x_ref[...]
        for w_ref, b_ref in agg:
            acc = jnp.dot(h, w_ref[...], preferred_element_type=jnp.float32)
            acc = acc + b_ref[...]
            h = (acc * jax.nn.sigmoid(acc)).astype(compute_dtype)

        # Per-selector MLP stacks (Linear only, no activation).  Each selector
        # writes its own lane-aligned column slice of the output slab.
        for i, layers in enumerate(sel):
            y = h
            acc = None
            for d, (w_ref, b_ref) in enumerate(layers):
                acc = jnp.dot(y, w_ref[...], preferred_element_type=jnp.float32)
                acc = acc + b_ref[...]
                if d + 1 < sel_depth:
                    y = acc.astype(compute_dtype)
            off = sel_col_offsets[i]
            width = sel_col_widths[i]
            out_ref[:, off:off + width] = acc.astype(out_ref.dtype)

    return kernel


# ---------------------------------------------------------------------------
# Parameters (synthetic, PyTorch-Linear-like init) and one-time preparation
# ---------------------------------------------------------------------------
def init_params(key, input_size, aggregation_layers, hidden_size, memory_size,
                feature_selection_layers, output_sizes, output_channels):
    """Weights are stored transposed as (in_features, out_features) so the
    kernel computes y = x @ W + b (== torch's x @ W.T with W (out, in))."""
    rnn_hidden = memory_size // 2

    def linear(k, fan_in, fan_out):
        k1, k2 = jax.random.split(k)
        scale = 1.0 / jnp.sqrt(jnp.float32(fan_in))
        w = jax.random.uniform(k1, (fan_in, fan_out), jnp.float32, -scale, scale)
        b = jax.random.uniform(k2, (fan_out,), jnp.float32, -scale, scale)
        return w, b

    n_keys = aggregation_layers + len(output_sizes) * feature_selection_layers
    keys = list(jax.random.split(key, n_keys))
    ki = 0

    agg = [linear(keys[ki], input_size, rnn_hidden)]
    ki += 1
    for _ in range(aggregation_layers - 1):
        agg.append(linear(keys[ki], rnn_hidden, rnn_hidden))
        ki += 1

    sel = []
    for shape, ch in zip(output_sizes, output_channels):
        layers = [linear(keys[ki], rnn_hidden, hidden_size)]
        ki += 1
        for _ in range(feature_selection_layers - 2):
            layers.append(linear(keys[ki], hidden_size, hidden_size))
            ki += 1
        layers.append(linear(keys[ki], hidden_size, shape * ch))
        ki += 1
        sel.append(layers)

    return {"agg": agg, "sel": sel}


def prepare_brain_params(params, input_size, hidden_size, memory_size,
                         output_sizes, output_channels,
                         compute_dtype=jnp.bfloat16):
    """Pad every dim to lane multiples; keep selectors as per-selector blocks.

    Called ONCE per parameter update (hoisted out of the per-step path).
    Padded lanes are exactly zero (weights, biases, inputs), and SiLU(0) == 0,
    so padded lanes stay zero through the whole network."""
    rnn_hidden = memory_size // 2
    n_sel = len(output_sizes)
    k0p = _round_up(input_size, LANE)
    hp = _round_up(rnn_hidden, LANE)
    hsp = _round_up(hidden_size, LANE)

    out_sizes = [sh * ch for sh, ch in zip(output_sizes, output_channels)]
    out_widths = [_round_up(s, LANE) for s in out_sizes]   # per-selector lane-aligned slot
    offsets, acc = [], 0
    for w in out_widths:
        offsets.append(acc)
        acc += w
    outp = acc

    def pad_linear(w, b, rows, cols):
        fi, fo = w.shape
        wp = jnp.zeros((rows, cols), compute_dtype).at[:fi, :fo].set(
            w.astype(compute_dtype))
        bp = jnp.zeros((1, cols), jnp.float32).at[0, :fo].set(b)
        return wp, bp

    agg_padded = []
    in_pad = k0p
    for w, b in params["agg"]:
        agg_padded.append(pad_linear(w, b, in_pad, hp))
        in_pad = hp

    depth = len(params["sel"][0])
    sel_padded = []
    for i, layers in enumerate(params["sel"]):
        padded = []
        for d, (w, b) in enumerate(layers):
            rows = hp if d == 0 else hsp
            cols = out_widths[i] if d == depth - 1 else hsp
            padded.append(pad_linear(w, b, rows, cols))
        sel_padded.append(padded)

    flat = []
    for w, b in agg_padded:
        flat += [w, b]
    for layers in sel_padded:
        for w, b in layers:
            flat += [w, b]

    meta = dict(
        k0p=k0p, hp=hp, hsp=hsp, outp=outp, n_sel=n_sel, depth=depth,
        num_agg=len(agg_padded), out_sizes=out_sizes, out_widths=out_widths,
        offsets=offsets, input_size=input_size, compute_dtype=compute_dtype,
        output_channels=list(output_channels),
        param_bytes=sum(int(a.nbytes) for a in flat),
    )
    return dict(flat=flat, meta=meta)


# ---------------------------------------------------------------------------
# Forward
# ---------------------------------------------------------------------------
def _vmem_budget_bytes():
    """Generation-aware scoped-VMEM cap + whether >=2 grid steps is preferred."""
    vmem_capacity = 128 * 1024 * 1024
    try:
        vmem_capacity = int(pltpu.get_tpu_info().vmem_capacity_bytes)
    except Exception:
        pass
    if vmem_capacity <= 64 * 1024 * 1024:
        # v7x-class: 64 MiB / TensorCore, 2 TCs -> leave ~12 MiB headroom and
        # prefer >=2 batch tiles so the "parallel" axis can shard across cores.
        return 52 * 1024 * 1024, True
    # v5e / v6e: 128 MiB physical; scoped default is only 16/32 MiB.
    return 100 * 1024 * 1024, False


def brain_rnn_forward(x, memories_mask, prepared):
    """Returns [ (B, output_channels[i], output_sizes[i]) ] like the module."""
    # TODO(synk): memories_mask only drives the LSTM memory-state side effect,
    # which does not affect the returned tensors; not implemented here.
    del memories_mask

    meta = prepared["meta"]
    flat = prepared["flat"]
    cdt = meta["compute_dtype"]
    k0p, outp = meta["k0p"], meta["outp"]
    b = x.shape[0]

    vmem_cap, prefer_two_tiles = _vmem_budget_bytes()

    # Adaptive batch tile: weights are VMEM-resident, so per-step VMEM only
    # grows with the widest activation row; prefer fewer, larger tiles.
    widest = max(k0p, meta["hp"], meta["hsp"], max(meta["out_widths"]), outp)
    itemsize = jnp.dtype(cdt).itemsize
    b_al = _round_up(max(b, 1), SUBLANE)
    tm = min(512, b_al)
    if prefer_two_tiles and b_al >= 2 * SUBLANE:
        tm = min(tm, _round_up((b_al + 1) // 2, SUBLANE))

    def step_bytes(t):
        io = 2 * (t * k0p * itemsize + t * outp * 4)   # double-buffered x / out
        act = 6 * t * widest * 4                       # in-kernel f32 intermediates
        return io + act

    while tm > SUBLANE and meta["param_bytes"] + step_bytes(tm) > vmem_cap:
        tm = max(SUBLANE, tm // 2)

    b_pad = _round_up(max(b, 1), tm)
    grid = (b_pad // tm,)

    x_pad = jnp.zeros((b_pad, k0p), cdt).at[:b, :meta["input_size"]].set(
        x.astype(cdt))
    inputs = [x_pad] + list(flat)

    # Advisory cost estimate (true per-selector FLOPs, no block-diag inflation).
    flops = 0
    in_dim = k0p
    for _ in range(meta["num_agg"]):
        flops += 2 * b_pad * in_dim * meta["hp"]
        in_dim = meta["hp"]
    for i in range(meta["n_sel"]):
        dims = [meta["hp"]] + [meta["hsp"]] * (meta["depth"] - 1) \
               + [meta["out_widths"][i]]
        for din, dout in zip(dims[:-1], dims[1:]):
            flops += 2 * b_pad * din * dout
    transcendentals = b_pad * meta["hp"] * meta["num_agg"]
    bytes_accessed = meta["param_bytes"] + int(x_pad.nbytes) + b_pad * outp * 4
    cost = pl.CostEstimate(flops=int(flops),
                           transcendentals=int(transcendentals),
                           bytes_accessed=int(bytes_accessed))

    kernel = make_brain_kernel(meta["num_agg"], meta["n_sel"], meta["depth"],
                               meta["offsets"], meta["out_widths"], cdt)

    def _run(single_buffer_weights):
        def weight_spec(shape):
            if single_buffer_weights:
                # Constant (0,0) block -> no need to double-buffer; halves the
                # resident parameter VMEM.
                return pl.BlockSpec(shape, lambda i: (0, 0),
                                    pipeline_mode=pl.Buffered(buffer_count=1))
            return pl.BlockSpec(shape, lambda i: (0, 0))

        in_specs = [pl.BlockSpec((tm, k0p), lambda i: (i, 0))]
        in_specs += [weight_spec(a.shape) for a in flat]
        out_specs = pl.BlockSpec((tm, outp), lambda i: (i, 0))

        param_buf = 1 if single_buffer_weights else 2
        need = param_buf * meta["param_bytes"] + step_bytes(tm) + (4 << 20)
        vmem_limit = int(min(vmem_cap, max(32 << 20, need)))

        out = pl.pallas_call(
            kernel,
            out_shape=jax.ShapeDtypeStruct((b_pad, outp), jnp.float32),
            grid_spec=pltpu.PrefetchScalarGridSpec(
                num_scalar_prefetch=0,
                grid=grid,
                in_specs=in_specs,
                out_specs=out_specs,
            ),
            compiler_params=pltpu.CompilerParams(
                dimension_semantics=("parallel",),
                vmem_limit_bytes=vmem_limit,
            ),
            cost_estimate=cost,
        )(*inputs)
        return jax.block_until_ready(out)

    try:
        out = _run(True)
    except Exception:
        # Fallback for builds without BlockSpec.pipeline_mode / Buffered(1).
        out = _run(False)

    # Strip padding, split the lane-aligned slab per selector, reshape like torch.
    outs = []
    for off, osz, ch in zip(meta["offsets"], meta["out_sizes"],
                            meta["output_channels"]):
        outs.append(out[:b, off:off + osz].reshape(b, ch, -1))
    return outs


# ---------------------------------------------------------------------------
# Pure-JAX reference (same bf16-matmul / f32-accumulate math)
# ---------------------------------------------------------------------------
def _reference_forward(x, params, output_channels, compute_dtype=jnp.bfloat16):
    h = x.astype(compute_dtype)
    for w, b in params["agg"]:
        a = jnp.dot(h, w.astype(compute_dtype),
                    preferred_element_type=jnp.float32) + b
        h = (a * jax.nn.sigmoid(a)).astype(compute_dtype)
    outs = []
    for layers, ch in zip(params["sel"], output_channels):
        y = h
        for d, (w, b) in enumerate(layers):
            a = jnp.dot(y, w.astype(compute_dtype),
                        preferred_element_type=jnp.float32) + b
            y = a.astype(compute_dtype) if d + 1 < len(layers) else a
        outs.append(y.reshape(x.shape[0], ch, -1))
    return outs


if __name__ == "__main__":
    # Small config consistent with the module's constructor.
    input_size = 16
    aggregation_layers = 2
    hidden_size = 32
    memory_size = 64            # rnn_hidden_size = 32
    feature_selection_layers = 3
    output_sizes = [8, 6]
    output_channels = [2, 3]
    batch = 4

    key = jax.random.PRNGKey(0)
    k_x, k_p = jax.random.split(key)
    x = jax.random.normal(k_x, (batch, input_size), jnp.float32)
    memories_mask = jnp.zeros((1, 1), jnp.int32)   # non-scalar => LSTM branch in torch

    params = init_params(k_p, input_size, aggregation_layers, hidden_size,
                         memory_size, feature_selection_layers,
                         output_sizes, output_channels)

    # One-time parameter preparation (hoisted out of the per-step path).
    prepared = prepare_brain_params(params, input_size, hidden_size, memory_size,
                                    output_sizes, output_channels)

    outs = brain_rnn_forward(x, memories_mask, prepared)
    outs = [jax.block_until_ready(o) for o in outs]

    refs = _reference_forward(x, params, output_channels)
    for o, r, ch, sh in zip(outs, refs, output_channels, output_sizes):
        assert o.shape == (batch, ch, sh), o.shape
        assert jnp.allclose(o, r, atol=2e-3, rtol=2e-3), float(jnp.max(jnp.abs(o - r)))

    print("KERNEL_OK")
</pallas_src>

<mosaic_0001>
module attributes {stable_mosaic.version = 11 : i64} {
  func.func @kernel(%arg0: i32, %arg1: memref<16x128xbf16, #tpu.memory_space<vmem>>, %arg2: memref<128x128xbf16, #tpu.memory_space<vmem>>, %arg3: memref<1x128xf32, #tpu.memory_space<vmem>>, %arg4: memref<128x128xbf16, #tpu.memory_space<vmem>>, %arg5: memref<1x128xf32, #tpu.memory_space<vmem>>, %arg6: memref<128x128xbf16, #tpu.memory_space<vmem>>, %arg7: memref<1x128xf32, #tpu.memory_space<vmem>>, %arg8: memref<128x128xbf16, #tpu.memory_space<vmem>>, %arg9: memref<1x128xf32, #tpu.memory_space<vmem>>, %arg10: memref<128x128xbf16, #tpu.memory_space<vmem>>, %arg11: memref<1x128xf32, #tpu.memory_space<vmem>>, %arg12: memref<128x128xbf16, #tpu.memory_space<vmem>>, %arg13: memref<1x128xf32, #tpu.memory_space<vmem>>, %arg14: memref<128x128xbf16, #tpu.memory_space<vmem>>, %arg15: memref<1x128xf32, #tpu.memory_space<vmem>>, %arg16: memref<128x128xbf16, #tpu.memory_space<vmem>>, %arg17: memref<1x128xf32, #tpu.memory_space<vmem>>, %arg18: memref<16x256xf32, #tpu.memory_space<vmem>>) attributes {dimension_semantics = [#tpu.dimension_semantics<parallel>], iteration_bounds = array<i64: 1>, scalar_prefetch = 0 : i64, scratch_operands = 0 : i64, tpu.core_type = #tpu.core_type<tc>, window_params = [{transform_indices = @transform_0, window_bounds = array<i64: 16, 128>}, {pipeline_mode = #tpu.pipeline_mode<synchronous>, transform_indices = @transform_1, window_bounds = array<i64: 128, 128>}, {pipeline_mode = #tpu.pipeline_mode<synchronous>, transform_indices = @transform_2, window_bounds = array<i64: 1, 128>}, {pipeline_mode = #tpu.pipeline_mode<synchronous>, transform_indices = @transform_3, window_bounds = array<i64: 128, 128>}, {pipeline_mode = #tpu.pipeline_mode<synchronous>, transform_indices = @transform_4, window_bounds = array<i64: 1, 128>}, {pipeline_mode = #tpu.pipeline_mode<synchronous>, transform_indices = @transform_5, window_bounds = array<i64: 128, 128>}, {pipeline_mode = #tpu.pipeline_mode<synchronous>, transform_indices = @transform_6, window_bounds = array<i64: 1, 128>}, {pipeline_mode = #tpu.pipeline_mode<synchronous>, transform_indices = @transform_7, window_bounds = array<i64: 128, 128>}, {pipeline_mode = #tpu.pipeline_mode<synchronous>, transform_indices = @transform_8, window_bounds = array<i64: 1, 128>}, {pipeline_mode = #tpu.pipeline_mode<synchronous>, transform_indices = @transform_9, window_bounds = array<i64: 128, 128>}, {pipeline_mode = #tpu.pipeline_mode<synchronous>, transform_indices = @transform_10, window_bounds = array<i64: 1, 128>}, {pipeline_mode = #tpu.pipeline_mode<synchronous>, transform_indices = @transform_11, window_bounds = array<i64: 128, 128>}, {pipeline_mode = #tpu.pipeline_mode<synchronous>, transform_indices = @transform_12, window_bounds = array<i64: 1, 128>}, {pipeline_mode = #tpu.pipeline_mode<synchronous>, transform_indices = @transform_13, window_bounds = array<i64: 128, 128>}, {pipeline_mode = #tpu.pipeline_mode<synchronous>, transform_indices = @transform_14, window_bounds = array<i64: 1, 128>}, {pipeline_mode = #tpu.pipeline_mode<synchronous>, transform_indices = @transform_15, window_bounds = array<i64: 128, 128>}, {pipeline_mode = #tpu.pipeline_mode<synchronous>, transform_indices = @transform_16, window_bounds = array<i64: 1, 128>}, {transform_indices = @transform_17, window_bounds = array<i64: 16, 256>}]} {
    %c0 = arith.constant 0 : index
    %c0_0 = arith.constant 0 : index
    %0 = vector.load %arg1[%c0, %c0_0] : memref<16x128xbf16, #tpu.memory_space<vmem>>, vector<16x128xbf16>
    %c0_1 = arith.constant 0 : index
    %c0_2 = arith.constant 0 : index
    %1 = vector.load %arg2[%c0_1, %c0_2] : memref<128x128xbf16, #tpu.memory_space<vmem>>, vector<128x128xbf16>
    %cst = arith.constant dense<0.000000e+00> : vector<16x128xf32>
    %2 = tpu.matmul %0, %1, %cst {dimension_numbers = #tpu.dot_dimension_numbers<[1], [0], [0], [1], [0, 0, 1, 1], [], []>} : vector<16x128xbf16>, vector<128x128xbf16>, vector<16x128xf32> -> vector<16x128xf32>
    %c0_3 = arith.constant 0 : index
    %c0_4 = arith.constant 0 : index
    %3 = vector.load %arg3[%c0_3, %c0_4] : memref<1x128xf32, #tpu.memory_space<vmem>>, vector<1x128xf32>
    %4 = vector.broadcast %3 : vector<1x128xf32> to vector<16x128xf32>
    %5 = arith.addf %2, %4 : vector<16x128xf32>
    %6 = arith.negf %5 : vector<16x128xf32>
    %7 = math.exp %6 : vector<16x128xf32>
    %cst_5 = arith.constant 1.000000e+00 : f32
    %8 = vector.broadcast %cst_5 : f32 to vector<16x128xf32>
    %9 = arith.addf %8, %7 : vector<16x128xf32>
    %10 = arith.divf %8, %9 : vector<16x128xf32>
    %11 = arith.mulf %5, %10 : vector<16x128xf32>
    %12 = arith.truncf %11 : vector<16x128xf32> to vector<16x128xbf16>
    %c0_6 = arith.constant 0 : index
    %c0_7 = arith.constant 0 : index
    %13 = vector.load %arg4[%c0_6, %c0_7] : memref<128x128xbf16, #tpu.memory_space<vmem>>, vector<128x128xbf16>
    %cst_8 = arith.constant dense<0.000000e+00> : vector<16x128xf32>
    %14 = tpu.matmul %12, %13, %cst_8 {dimension_numbers = #tpu.dot_dimension_numbers<[1], [0], [0], [1], [0, 0, 1, 1], [], []>} : vector<16x128xbf16>, vector<128x128xbf16>, vector<16x128xf32> -> vector<16x128xf32>
    %c0_9 = arith.constant 0 : index
    %c0_10 = arith.constant 0 : index
    %15 = vector.load %arg5[%c0_9, %c0_10] : memref<1x128xf32, #tpu.memory_space<vmem>>, vector<1x128xf32>
    %16 = vector.broadcast %15 : vector<1x128xf32> to vector<16x128xf32>
    %17 = arith.addf %14, %16 : vector<16x128xf32>
    %18 = arith.negf %17 : vector<16x128xf32>
    %19 = math.exp %18 : vector<16x128xf32>
    %cst_11 = arith.constant 1.000000e+00 : f32
    %20 = vector.broadcast %cst_11 : f32 to vector<16x128xf32>
    %21 = arith.addf %20, %19 : vector<16x128xf32>
    %22 = arith.divf %20, %21 : vector<16x128xf32>
    %23 = arith.mulf %17, %22 : vector<16x128xf32>
    %24 = arith.truncf %23 : vector<16x128xf32> to vector<16x128xbf16>
    %c0_12 = arith.constant 0 : index
    %c0_13 = arith.constant 0 : index
    %25 = vector.load %arg6[%c0_12, %c0_13] : memref<128x128xbf16, #tpu.memory_space<vmem>>, vector<128x128xbf16>
    %cst_14 = arith.constant dense<0.000000e+00> : vector<16x128xf32>
    %26 = tpu.matmul %24, %25, %cst_14 {dimension_numbers = #tpu.dot_dimension_numbers<[1], [0], [0], [1], [0, 0, 1, 1], [], []>} : vector<16x128xbf16>, vector<128x128xbf16>, vector<16x128xf32> -> vector<16x128xf32>
    %c0_15 = arith.constant 0 : index
    %c0_16 = arith.constant 0 : index
    %27 = vector.load %arg7[%c0_15, %c0_16] : memref<1x128xf32, #tpu.memory_space<vmem>>, vector<1x128xf32>
    %28 = vector.broadcast %27 : vector<1x128xf32> to vector<16x128xf32>
    %29 = arith.addf %26, %28 : vector<16x128xf32>
    %30 = arith.truncf %29 : vector<16x128xf32> to vector<16x128xbf16>
    %c0_17 = arith.constant 0 : index
    %c0_18 = arith.constant 0 : index
    %31 = vector.load %arg8[%c0_17, %c0_18] : memref<128x128xbf16, #tpu.memory_space<vmem>>, vector<128x128xbf16>
    %cst_19 = arith.constant dense<0.000000e+00> : vector<16x128xf32>
    %32 = tpu.matmul %30, %31, %cst_19 {dimension_numbers = #tpu.dot_dimension_numbers<[1], [0], [0], [1], [0, 0, 1, 1], [], []>} : vector<16x128xbf16>, vector<128x128xbf16>, vector<16x128xf32> -> vector<16x128xf32>
    %c0_20 = arith.constant 0 : index
    %c0_21 = arith.constant 0 : index
    %33 = vector.load %arg9[%c0_20, %c0_21] : memref<1x128xf32, #tpu.memory_space<vmem>>, vector<1x128xf32>
    %34 = vector.broadcast %33 : vector<1x128xf32> to vector<16x128xf32>
    %35 = arith.addf %32, %34 : vector<16x128xf32>
    %36 = arith.truncf %35 : vector<16x128xf32> to vector<16x128xbf16>
    %c0_22 = arith.constant 0 : index
    %c0_23 = arith.constant 0 : index
    %37 = vector.load %arg10[%c0_22, %c0_23] : memref<128x128xbf16, #tpu.memory_space<vmem>>, vector<128x128xbf16>
    %cst_24 = arith.constant dense<0.000000e+00> : vector<16x128xf32>
    %38 = tpu.matmul %36, %37, %cst_24 {dimension_numbers = #tpu.dot_dimension_numbers<[1], [0], [0], [1], [0, 0, 1, 1], [], []>} : vector<16x128xbf16>, vector<128x128xbf16>, vector<16x128xf32> -> vector<16x128xf32>
    %c0_25 = arith.constant 0 : index
    %c0_26 = arith.constant 0 : index
    %39 = vector.load %arg11[%c0_25, %c0_26] : memref<1x128xf32, #tpu.memory_space<vmem>>, vector<1x128xf32>
    %40 = vector.broadcast %39 : vector<1x128xf32> to vector<16x128xf32>
    %41 = arith.addf %38, %40 : vector<16x128xf32>
    %c0_27 = arith.constant 0 : index
    %c0_28 = arith.constant 0 : index
    %42 = vector.load %arg18[%c0_27, %c0_28] : memref<16x256xf32, #tpu.memory_space<vmem>>, vector<16x128xf32>
    tpu.vector_store %arg18[%c0_27, %c0_28], %41 {strides = array<i32>} : memref<16x256xf32, #tpu.memory_space<vmem>>, vector<16x128xf32>,
    %c0_29 = arith.constant 0 : index
    %c0_30 = arith.constant 0 : index
    %43 = vector.load %arg12[%c0_29, %c0_30] : memref<128x128xbf16, #tpu.memory_space<vmem>>, vector<128x128xbf16>
    %cst_31 = arith.constant dense<0.000000e+00> : vector<16x128xf32>
    %44 = tpu.matmul %24, %43, %cst_31 {dimension_numbers = #tpu.dot_dimension_numbers<[1], [0], [0], [1], [0, 0, 1, 1], [], []>} : vector<16x128xbf16>, vector<128x128xbf16>, vector<16x128xf32> -> vector<16x128xf32>
    %c0_32 = arith.constant 0 : index
    %c0_33 = arith.constant 0 : index
    %45 = vector.load %arg13[%c0_32, %c0_33] : memref<1x128xf32, #tpu.memory_space<vmem>>, vector<1x128xf32>
    %46 = vector.broadcast %45 : vector<1x128xf32> to vector<16x128xf32>
    %47 = arith.addf %44, %46 : vector<16x128xf32>
    %48 = arith.truncf %47 : vector<16x128xf32> to vector<16x128xbf16>
    %c0_34 = arith.constant 0 : index
    %c0_35 = arith.constant 0 : index
    %49 = vector.load %arg14[%c0_34, %c0_35] : memref<128x128xbf16, #tpu.memory_space<vmem>>, vector<128x128xbf16>
    %cst_36 = arith.constant dense<0.000000e+00> : vector<16x128xf32>
    %50 = tpu.matmul %48, %49, %cst_36 {dimension_numbers = #tpu.dot_dimension_numbers<[1], [0], [0], [1], [0, 0, 1, 1], [], []>} : vector<16x128xbf16>, vector<128x128xbf16>, vector<16x128xf32> -> vector<16x128xf32>
    %c0_37 = arith.constant 0 : index
    %c0_38 = arith.constant 0 : index
    %51 = vector.load %arg15[%c0_37, %c0_38] : memref<1x128xf32, #tpu.memory_space<vmem>>, vector<1x128xf32>
    %52 = vector.broadcast %51 : vector<1x128xf32> to vector<16x128xf32>
    %53 = arith.addf %50, %52 : vector<16x128xf32>
    %54 = arith.truncf %53 : vector<16x128xf32> to vector<16x128xbf16>
    %c0_39 = arith.constant 0 : index
    %c0_40 = arith.constant 0 : index
    %55 = vector.load %arg16[%c0_39, %c0_40] : memref<128x128xbf16, #tpu.memory_space<vmem>>, vector<128x128xbf16>
    %cst_41 = arith.constant dense<0.000000e+00> : vector<16x128xf32>
    %56 = tpu.matmul %54, %55, %cst_41 {dimension_numbers = #tpu.dot_dimension_numbers<[1], [0], [0], [1], [0, 0, 1, 1], [], []>} : vector<16x128xbf16>, vector<128x128xbf16>, vector<16x128xf32> -> vector<16x128xf32>
    %c0_42 = arith.constant 0 : index
    %c0_43 = arith.constant 0 : index
    %57 = vector.load %arg17[%c0_42, %c0_43] : memref<1x128xf32, #tpu.memory_space<vmem>>, vector<1x128xf32>
    %58 = vector.broadcast %57 : vector<1x128xf32> to vector<16x128xf32>
    %59 = arith.addf %56, %58 : vector<16x128xf32>
    %c0_44 = arith.constant 0 : index
    %c128 = arith.constant 128 : index
    %60 = vector.load %arg18[%c0_44, %c128] : memref<16x256xf32, #tpu.memory_space<vmem>>, vector<16x128xf32>
    tpu.vector_store %arg18[%c0_44, %c128], %59 {strides = array<i32>} : memref<16x256xf32, #tpu.memory_space<vmem>>, vector<16x128xf32>,
    return
  }
  func.func @transform_0(%arg0: i32) -> (i32, i32) {
    %c0_i32 = arith.constant 0 : i32
    %c0_i32_0 = arith.constant 0 : i32
    return %arg0, %c0_i32 : i32, i32
  }
  func.func @transform_1(%arg0: i32) -> (i32, i32) {
    %c0_i32 = arith.constant 0 : i32
    %c0_i32_0 = arith.constant 0 : i32
    %c0_i32_1 = arith.constant 0 : i32
    return %c0_i32, %c0_i32_0 : i32, i32
  }
  func.func @transform_2(%arg0: i32) -> (i32, i32) {
    %c0_i32 = arith.constant 0 : i32
    %c0_i32_0 = arith.constant 0 : i32
    %c0_i32_1 = arith.constant 0 : i32
    return %c0_i32, %c0_i32_0 : i32, i32
  }
  func.func @transform_3(%arg0: i32) -> (i32, i32) {
    %c0_i32 = arith.constant 0 : i32
    %c0_i32_0 = arith.constant 0 : i32
    %c0_i32_1 = arith.constant 0 : i32
    return %c0_i32, %c0_i32_0 : i32, i32
  }
  func.func @transform_4(%arg0: i32) -> (i32, i32) {
    %c0_i32 = arith.constant 0 : i32
    %c0_i32_0 = arith.constant 0 : i32
    %c0_i32_1 = arith.constant 0 : i32
    return %c0_i32, %c0_i32_0 : i32, i32
  }
  func.func @transform_5(%arg0: i32) -> (i32, i32) {
    %c0_i32 = arith.constant 0 : i32
    %c0_i32_0 = arith.constant 0 : i32
    %c0_i32_1 = arith.constant 0 : i32
    return %c0_i32, %c0_i32_0 : i32, i32
  }
  func.func @transform_6(%arg0: i32) -> (i32, i32) {
    %c0_i32 = arith.constant 0 : i32
    %c0_i32_0 = arith.constant 0 : i32
    %c0_i32_1 = arith.constant 0 : i32
    return %c0_i32, %c0_i32_0 : i32, i32
  }
  func.func @transform_7(%arg0: i32) -> (i32, i32) {
    %c0_i32 = arith.constant 0 : i32
    %c0_i32_0 = arith.constant 0 : i32
    %c0_i32_1 = arith.constant 0 : i32
    return %c0_i32, %c0_i32_0 : i32, i32
  }
  func.func @transform_8(%arg0: i32) -> (i32, i32) {
    %c0_i32 = arith.constant 0 : i32
    %c0_i32_0 = arith.constant 0 : i32
    %c0_i32_1 = arith.constant 0 : i32
    return %c0_i32, %c0_i32_0 : i32, i32
  }
  func.func @transform_9(%arg0: i32) -> (i32, i32) {
    %c0_i32 = arith.constant 0 : i32
    %c0_i32_0 = arith.constant 0 : i32
    %c0_i32_1 = arith.constant 0 : i32
    return %c0_i32, %c0_i32_0 : i32, i32
  }
  func.func @transform_10(%arg0: i32) -> (i32, i32) {
    %c0_i32 = arith.constant 0 : i32
    %c0_i32_0 = arith.constant 0 : i32
    %c0_i32_1 = arith.constant 0 : i32
    return %c0_i32, %c0_i32_0 : i32, i32
  }
  func.func @transform_11(%arg0: i32) -> (i32, i32) {
    %c0_i32 = arith.constant 0 : i32
    %c0_i32_0 = arith.constant 0 : i32
    %c0_i32_1 = arith.constant 0 : i32
    return %c0_i32, %c0_i32_0 : i32, i32
  }
  func.func @transform_12(%arg0: i32) -> (i32, i32) {
    %c0_i32 = arith.constant 0 : i32
    %c0_i32_0 = arith.constant 0 : i32
    %c0_i32_1 = arith.constant 0 : i32
    return %c0_i32, %c0_i32_0 : i32, i32
  }
  func.func @transform_13(%arg0: i32) -> (i32, i32) {
    %c0_i32 = arith.constant 0 : i32
    %c0_i32_0 = arith.constant 0 : i32
    %c0_i32_1 = arith.constant 0 : i32
    return %c0_i32, %c0_i32_0 : i32, i32
  }
  func.func @transform_14(%arg0: i32) -> (i32, i32) {
    %c0_i32 = arith.constant 0 : i32
    %c0_i32_0 = arith.constant 0 : i32
    %c0_i32_1 = arith.constant 0 : i32
    return %c0_i32, %c0_i32_0 : i32, i32
  }
  func.func @transform_15(%arg0: i32) -> (i32, i32) {
    %c0_i32 = arith.constant 0 : i32
    %c0_i32_0 = arith.constant 0 : i32
    %c0_i32_1 = arith.constant 0 : i32
    return %c0_i32, %c0_i32_0 : i32, i32
  }
  func.func @transform_16(%arg0: i32) -> (i32, i32) {
    %c0_i32 = arith.constant 0 : i32
    %c0_i32_0 = arith.constant 0 : i32
    %c0_i32_1 = arith.constant 0 : i32
    return %c0_i32, %c0_i32_0 : i32, i32
  }
  func.func @transform_17(%arg0: i32) -> (i32, i32) {
    %c0_i32 = arith.constant 0 : i32
    %c0_i32_0 = arith.constant 0 : i32
    return %arg0, %c0_i32 : i32, i32
  }
}

module attributes {stable_mosaic.version = 11 : i64} {
  func.func @kernel(%arg0: i32, %arg1: memref<16x128xbf16, #tpu.memory_space<vmem>>, %arg2: memref<128x128xbf16, #tpu.memory_space<vmem>>, %arg3: memref<1x128xf32, #tpu.memory_space<vmem>>, %arg4: memref<128x128xbf16, #tpu.memory_space<vmem>>, %arg5: memref<1x128xf32, #tpu.memory_space<vmem>>, %arg6: memref<128x128xbf16, #tpu.memory_space<vmem>>, %arg7: memref<1x128xf32, #tpu.memory_space<vmem>>, %arg8: memref<128x128xbf16, #tpu.memory_space<vmem>>, %arg9: memref<1x128xf32, #tpu.memory_space<vmem>>, %arg10: memref<128x128xbf16, #tpu.memory_space<vmem>>, %arg11: memref<1x128xf32, #tpu.memory_space<vmem>>, %arg12: memref<128x128xbf16, #tpu.memory_space<vmem>>, %arg13: memref<1x128xf32, #tpu.memory_space<vmem>>, %arg14: memref<128x128xbf16, #tpu.memory_space<vmem>>, %arg15: memref<1x128xf32, #tpu.memory_space<vmem>>, %arg16: memref<128x128xbf16, #tpu.memory_space<vmem>>, %arg17: memref<1x128xf32, #tpu.memory_space<vmem>>, %arg18: memref<16x256xf32, #tpu.memory_space<vmem>>) attributes {dimension_semantics = [#tpu.dimension_semantics<parallel>], iteration_bounds = array<i64: 1>, scalar_prefetch = 0 : i64, scratch_operands = 0 : i64, tpu.core_type = #tpu.core_type<tc>, window_params = [{transform_indices = @transform_0, window_bounds = array<i64: 16, 128>}, {pipeline_mode = #tpu.pipeline_mode<synchronous>, transform_indices = @transform_1, window_bounds = array<i64: 128, 128>}, {pipeline_mode = #tpu.pipeline_mode<synchronous>, transform_indices = @transform_2, window_bounds = array<i64: 1, 128>}, {pipeline_mode = #tpu.pipeline_mode<synchronous>, transform_indices = @transform_3, window_bounds = array<i64: 128, 128>}, {pipeline_mode = #tpu.pipeline_mode<synchronous>, transform_indices = @transform_4, window_bounds = array<i64: 1, 128>}, {pipeline_mode = #tpu.pipeline_mode<synchronous>, transform_indices = @transform_5, window_bounds = array<i64: 128, 128>}, {pipeline_mode = #tpu.pipeline_mode<synchronous>, transform_indices = @transform_6, window_bounds = array<i64: 1, 128>}, {pipeline_mode = #tpu.pipeline_mode<synchronous>, transform_indices = @transform_7, window_bounds = array<i64: 128, 128>}, {pipeline_mode = #tpu.pipeline_mode<synchronous>, transform_indices = @transform_8, window_bounds = array<i64: 1, 128>}, {pipeline_mode = #tpu.pipeline_mode<synchronous>, transform_indices = @transform_9, window_bounds = array<i64: 128, 128>}, {pipeline_mode = #tpu.pipeline_mode<synchronous>, transform_indices = @transform_10, window_bounds = array<i64: 1, 128>}, {pipeline_mode = #tpu.pipeline_mode<synchronous>, transform_indices = @transform_11, window_bounds = array<i64: 128, 128>}, {pipeline_mode = #tpu.pipeline_mode<synchronous>, transform_indices = @transform_12, window_bounds = array<i64: 1, 128>}, {pipeline_mode = #tpu.pipeline_mode<synchronous>, transform_indices = @transform_13, window_bounds = array<i64: 128, 128>}, {pipeline_mode = #tpu.pipeline_mode<synchronous>, transform_indices = @transform_14, window_bounds = array<i64: 1, 128>}, {pipeline_mode = #tpu.pipeline_mode<synchronous>, transform_indices = @transform_15, window_bounds = array<i64: 128, 128>}, {pipeline_mode = #tpu.pipeline_mode<synchronous>, transform_indices = @transform_16, window_bounds = array<i64: 1, 128>}, {transform_indices = @transform_17, window_bounds = array<i64: 16, 256>}]} {
    %c0 = arith.constant 0 : index
    %c0_0 = arith.constant 0 : index
    %0 = vector.load %arg1[%c0, %c0_0] : memref<16x128xbf16, #tpu.memory_space<vmem>>, vector<16x128xbf16>
    %c0_1 = arith.constant 0 : index
    %c0_2 = arith.constant 0 : index
    %1 = vector.load %arg2[%c0_1, %c0_2] : memref<128x128xbf16, #tpu.memory_space<vmem>>, vector<128x128xbf16>
    %cst = arith.constant dense<0.000000e+00> : vector<16x128xf32>
    %2 = tpu.matmul %0, %1, %cst {dimension_numbers = #tpu.dot_dimension_numbers<[1], [0], [0], [1], [0, 0, 1, 1], [], []>} : vector<16x128xbf16>, vector<128x128xbf16>, vector<16x128xf32> -> vector<16x128xf32>
    %c0_3 = arith.constant 0 : index
    %c0_4 = arith.constant 0 : index
    %3 = vector.load %arg3[%c0_3, %c0_4] : memref<1x128xf32, #tpu.memory_space<vmem>>, vector<1x128xf32>
    %4 = vector.broadcast %3 : vector<1x128xf32> to vector<16x128xf32>
    %5 = arith.addf %2, %4 : vector<16x128xf32>
    %6 = arith.negf %5 : vector<16x128xf32>
    %7 = math.exp %6 : vector<16x128xf32>
    %cst_5 = arith.constant 1.000000e+00 : f32
    %8 = vector.broadcast %cst_5 : f32 to vector<16x128xf32>
    %9 = arith.addf %8, %7 : vector<16x128xf32>
    %10 = arith.divf %8, %9 : vector<16x128xf32>
    %11 = arith.mulf %5, %10 : vector<16x128xf32>
    %12 = arith.truncf %11 : vector<16x128xf32> to vector<16x128xbf16>
    %c0_6 = arith.constant 0 : index
    %c0_7 = arith.constant 0 : index
    %13 = vector.load %arg4[%c0_6, %c0_7] : memref<128x128xbf16, #tpu.memory_space<vmem>>, vector<128x128xbf16>
    %cst_8 = arith.constant dense<0.000000e+00> : vector<16x128xf32>
    %14 = tpu.matmul %12, %13, %cst_8 {dimension_numbers = #tpu.dot_dimension_numbers<[1], [0], [0], [1], [0, 0, 1, 1], [], []>} : vector<16x128xbf16>, vector<128x128xbf16>, vector<16x128xf32> -> vector<16x128xf32>
    %c0_9 = arith.constant 0 : index
    %c0_10 = arith.constant 0 : index
    %15 = vector.load %arg5[%c0_9, %c0_10] : memref<1x128xf32, #tpu.memory_space<vmem>>, vector<1x128xf32>
    %16 = vector.broadcast %15 : vector<1x128xf32> to vector<16x128xf32>
    %17 = arith.addf %14, %16 : vector<16x128xf32>
    %18 = arith.negf %17 : vector<16x128xf32>
    %19 = math.exp %18 : vector<16x128xf32>
    %cst_11 = arith.constant 1.000000e+00 : f32
    %20 = vector.broadcast %cst_11 : f32 to vector<16x128xf32>
    %21 = arith.addf %20, %19 : vector<16x128xf32>
    %22 = arith.divf %20, %21 : vector<16x128xf32>
    %23 = arith.mulf %17, %22 : vector<16x128xf32>
    %24 = arith.truncf %23 : vector<16x128xf32> to vector<16x128xbf16>
    %c0_12 = arith.constant 0 : index
    %c0_13 = arith.constant 0 : index
    %25 = vector.load %arg6[%c0_12, %c0_13] : memref<128x128xbf16, #tpu.memory_space<vmem>>, vector<128x128xbf16>
    %cst_14 = arith.constant dense<0.000000e+00> : vector<16x128xf32>
    %26 = tpu.matmul %24, %25, %cst_14 {dimension_numbers = #tpu.dot_dimension_numbers<[1], [0], [0], [1], [0, 0, 1, 1], [], []>} : vector<16x128xbf16>, vector<128x128xbf16>, vector<16x128xf32> -> vector<16x128xf32>
    %c0_15 = arith.constant 0 : index
    %c0_16 = arith.constant 0 : index
    %27 = vector.load %arg7[%c0_15, %c0_16] : memref<1x128xf32, #tpu.memory_space<vmem>>, vector<1x128xf32>
    %28 = vector.broadcast %27 : vector<1x128xf32> to vector<16x128xf32>
    %29 = arith.addf %26, %28 : vector<16x128xf32>
    %30 = arith.truncf %29 : vector<16x128xf32> to vector<16x128xbf16>
    %c0_17 = arith.constant 0 : index
    %c0_18 = arith.constant 0 : index
    %31 = vector.load %arg8[%c0_17, %c0_18] : memref<128x128xbf16, #tpu.memory_space<vmem>>, vector<128x128xbf16>
    %cst_19 = arith.constant dense<0.000000e+00> : vector<16x128xf32>
    %32 = tpu.matmul %30, %31, %cst_19 {dimension_numbers = #tpu.dot_dimension_numbers<[1], [0], [0], [1], [0, 0, 1, 1], [], []>} : vector<16x128xbf16>, vector<128x128xbf16>, vector<16x128xf32> -> vector<16x128xf32>
    %c0_20 = arith.constant 0 : index
    %c0_21 = arith.constant 0 : index
    %33 = vector.load %arg9[%c0_20, %c0_21] : memref<1x128xf32, #tpu.memory_space<vmem>>, vector<1x128xf32>
    %34 = vector.broadcast %33 : vector<1x128xf32> to vector<16x128xf32>
    %35 = arith.addf %32, %34 : vector<16x128xf32>
    %36 = arith.truncf %35 : vector<16x128xf32> to vector<16x128xbf16>
    %c0_22 = arith.constant 0 : index
    %c0_23 = arith.constant 0 : index
    %37 = vector.load %arg10[%c0_22, %c0_23] : memref<128x128xbf16, #tpu.memory_space<vmem>>, vector<128x128xbf16>
    %cst_24 = arith.constant dense<0.000000e+00> : vector<16x128xf32>
    %38 = tpu.matmul %36, %37, %cst_24 {dimension_numbers = #tpu.dot_dimension_numbers<[1], [0], [0], [1], [0, 0, 1, 1], [], []>} : vector<16x128xbf16>, vector<128x128xbf16>, vector<16x128xf32> -> vector<16x128xf32>
    %c0_25 = arith.constant 0 : index
    %c0_26 = arith.constant 0 : index
    %39 = vector.load %arg11[%c0_25, %c0_26] : memref<1x128xf32, #tpu.memory_space<vmem>>, vector<1x128xf32>
    %40 = vector.broadcast %39 : vector<1x128xf32> to vector<16x128xf32>
    %41 = arith.addf %38, %40 : vector<16x128xf32>
    %c0_27 = arith.constant 0 : index
    %c0_28 = arith.constant 0 : index
    %42 = vector.load %arg18[%c0_27, %c0_28] : memref<16x256xf32, #tpu.memory_space<vmem>>, vector<16x128xf32>
    tpu.vector_store %arg18[%c0_27, %c0_28], %41 {strides = array<i32>} : memref<16x256xf32, #tpu.memory_space<vmem>>, vector<16x128xf32>,
    %c0_29 = arith.constant 0 : index
    %c0_30 = arith.constant 0 : index
    %43 = vector.load %arg12[%c0_29, %c0_30] : memref<128x128xbf16, #tpu.memory_space<vmem>>, vector<128x128xbf16>
    %cst_31 = arith.constant dense<0.000000e+00> : vector<16x128xf32>
    %44 = tpu.matmul %24, %43, %cst_31 {dimension_numbers = #tpu.dot_dimension_numbers<[1], [0], [0], [1], [0, 0, 1, 1], [], []>} : vector<16x128xbf16>, vector<128x128xbf16>, vector<16x128xf32> -> vector<16x128xf32>
    %c0_32 = arith.constant 0 : index
    %c0_33 = arith.constant 0 : index
    %45 = vector.load %arg13[%c0_32, %c0_33] : memref<1x128xf32, #tpu.memory_space<vmem>>, vector<1x128xf32>
    %46 = vector.broadcast %45 : vector<1x128xf32> to vector<16x128xf32>
    %47 = arith.addf %44, %46 : vector<16x128xf32>
    %48 = arith.truncf %47 : vector<16x128xf32> to vector<16x128xbf16>
    %c0_34 = arith.constant 0 : index
    %c0_35 = arith.constant 0 : index
    %49 = vector.load %arg14[%c0_34, %c0_35] : memref<128x128xbf16, #tpu.memory_space<vmem>>, vector<128x128xbf16>
    %cst_36 = arith.constant dense<0.000000e+00> : vector<16x128xf32>
    %50 = tpu.matmul %48, %49, %cst_36 {dimension_numbers = #tpu.dot_dimension_numbers<[1], [0], [0], [1], [0, 0, 1, 1], [], []>} : vector<16x128xbf16>, vector<128x128xbf16>, vector<16x128xf32> -> vector<16x128xf32>
    %c0_37 = arith.constant 0 : index
    %c0_38 = arith.constant 0 : index
    %51 = vector.load %arg15[%c0_37, %c0_38] : memref<1x128xf32, #tpu.memory_space<vmem>>, vector<1x128xf32>
    %52 = vector.broadcast %51 : vector<1x128xf32> to vector<16x128xf32>
    %53 = arith.addf %50, %52 : vector<16x128xf32>
    %54 = arith.truncf %53 : vector<16x128xf32> to vector<16x128xbf16>
    %c0_39 = arith.constant 0 : index
    %c0_40 = arith.constant 0 : index
    %55 = vector.load %arg16[%c0_39, %c0_40] : memref<128x128xbf16, #tpu.memory_space<vmem>>, vector<128x128xbf16>
    %cst_41 = arith.constant dense<0.000000e+00> : vector<16x128xf32>
    %56 = tpu.matmul %54, %55, %cst_41 {dimension_numbers = #tpu.dot_dimension_numbers<[1], [0], [0], [1], [0, 0, 1, 1], [], []>} : vector<16x128xbf16>, vector<128x128xbf16>, vector<16x128xf32> -> vector<16x128xf32>
    %c0_42 = arith.constant 0 : index
    %c0_43 = arith.constant 0 : index
    %57 = vector.load %arg17[%c0_42, %c0_43] : memref<1x128xf32, #tpu.memory_space<vmem>>, vector<1x128xf32>
    %58 = vector.broadcast %57 : vector<1x128xf32> to vector<16x128xf32>
    %59 = arith.addf %56, %58 : vector<16x128xf32>
    %c0_44 = arith.constant 0 : index
    %c128 = arith.constant 128 : index
    %60 = vector.load %arg18[%c0_44, %c128] : memref<16x256xf32, #tpu.memory_space<vmem>>, vector<16x128xf32>
    tpu.vector_store %arg18[%c0_44, %c128], %59 {strides = array<i32>} : memref<16x256xf32, #tpu.memory_space<vmem>>, vector<16x128xf32>,
    return
  }
  func.func @transform_0(%arg0: i32) -> (i32, i32) {
    %c0_i32 = arith.constant 0 : i32
    %c0_i32_0 = arith.constant 0 : i32
    return %arg0, %c0_i32 : i32, i32
  }
  func.func @transform_1(%arg0: i32) -> (i32, i32) {
    %c0_i32 = arith.constant 0 : i32
    %c0_i32_0 = arith.constant 0 : i32
    %c0_i32_1 = arith.constant 0 : i32
    return %c0_i32, %c0_i32_0 : i32, i32
  }
  func.func @transform_2(%arg0: i32) -> (i32, i32) {
    %c0_i32 = arith.constant 0 : i32
    %c0_i32_0 = arith.constant 0 : i32
    %c0_i32_1 = arith.constant 0 : i32
    return %c0_i32, %c0_i32_0 : i32, i32
  }
  func.func @transform_3(%arg0: i32) -> (i32, i32) {
    %c0_i32 = arith.constant 0 : i32
    %c0_i32_0 = arith.constant 0 : i32
    %c0_i32_1 = arith.constant 0 : i32
    return %c0_i32, %c0_i32_0 : i32, i32
  }
  func.func @transform_4(%arg0: i32) -> (i32, i32) {
    %c0_i32 = arith.constant 0 : i32
    %c0_i32_0 = arith.constant 0 : i32
    %c0_i32_1 = arith.constant 0 : i32
    return %c0_i32, %c0_i32_0 : i32, i32
  }
  func.func @transform_5(%arg0: i32) -> (i32, i32) {
    %c0_i32 = arith.constant 0 : i32
    %c0_i32_0 = arith.constant 0 : i32
    %c0_i32_1 = arith.constant 0 : i32
    return %c0_i32, %c0_i32_0 : i32, i32
  }
  func.func @transform_6(%arg0: i32) -> (i32, i32) {
    %c0_i32 = arith.constant 0 : i32
    %c0_i32_0 = arith.constant 0 : i32
    %c0_i32_1 = arith.constant 0 : i32
    return %c0_i32, %c0_i32_0 : i32, i32
  }
  func.func @transform_7(%arg0: i32) -> (i32, i32) {
    %c0_i32 = arith.constant 0 : i32
    %c0_i32_0 = arith.constant 0 : i32
    %c0_i32_1 = arith.constant 0 : i32
    return %c0_i32, %c0_i32_0 : i32, i32
  }
  func.func @transform_8(%arg0: i32) -> (i32, i32) {
    %c0_i32 = arith.constant 0 : i32
    %c0_i32_0 = arith.constant 0 : i32
    %c0_i32_1 = arith.constant 0 : i32
    return %c0_i32, %c0_i32_0 : i32, i32
  }
  func.func @transform_9(%arg0: i32) -> (i32, i32) {
    %c0_i32 = arith.constant 0 : i32
    %c0_i32_0 = arith.constant 0 : i32
    %c0_i32_1 = arith.constant 0 : i32
    return %c0_i32, %c0_i32_0 : i32, i32
  }
  func.func @transform_10(%arg0: i32) -> (i32, i32) {
    %c0_i32 = arith.constant 0 : i32
    %c0_i32_0 = arith.constant 0 : i32
    %c0_i32_1 = arith.constant 0 : i32
    return %c0_i32, %c0_i32_0 : i32, i32
  }
  func.func @transform_11(%arg0: i32) -> (i32, i32) {
    %c0_i32 = arith.constant 0 : i32
    %c0_i32_0 = arith.constant 0 : i32
    %c0_i32_1 = arith.constant 0 : i32
    return %c0_i32, %c0_i32_0 : i32, i32
  }
  func.func @transform_12(%arg0: i32) -> (i32, i32) {
    %c0_i32 = arith.constant 0 : i32
    %c0_i32_0 = arith.constant 0 : i32
    %c0_i32_1 = arith.constant 0 : i32
    return %c0_i32, %c0_i32_0 : i32, i32
  }
  func.func @transform_13(%arg0: i32) -> (i32, i32) {
    %c0_i32 = arith.constant 0 : i32
    %c0_i32_0 = arith.constant 0 : i32
    %c0_i32_1 = arith.constant 0 : i32
    return %c0_i32, %c0_i32_0 : i32, i32
  }
  func.func @transform_14(%arg0: i32) -> (i32, i32) {
    %c0_i32 = arith.constant 0 : i32
    %c0_i32_0 = arith.constant 0 : i32
    %c0_i32_1 = arith.constant 0 : i32
    return %c0_i32, %c0_i32_0 : i32, i32
  }
  func.func @transform_15(%arg0: i32) -> (i32, i32) {
    %c0_i32 = arith.constant 0 : i32
    %c0_i32_0 = arith.constant 0 : i32
    %c0_i32_1 = arith.constant 0 : i32
    return %c0_i32, %c0_i32_0 : i32, i32
  }
  func.func @transform_16(%arg0: i32) -> (i32, i32) {
    %c0_i32 = arith.constant 0 : i32
    %c0_i32_0 = arith.constant 0 : i32
    %c0_i32_1 = arith.constant 0 : i32
    return %c0_i32, %c0_i32_0 : i32, i32
  }
  func.func @transform_17(%arg0: i32) -> (i32, i32) {
    %c0_i32 = arith.constant 0 : i32
    %c0_i32_0 = arith.constant 0 : i32
    return %arg0, %c0_i32 : i32, i32
  }
}

</mosaic_0001>

<bundles_post_ra>
// kernel: tpu_custom_call.1
= control target key start
LH: loop header
LB: loop body
LE: loop exit
PB: predicated region body
PF: predicated region fallthrough
CT: control target
= control target key end

     0   :  { %s2166_s0 = inlined_call_operand.hbm [shape: bf16[16,128], index: 0, kind: input, shape index: {}]   ;;  %s2167_s1 = inlined_call_operand.hbm [shape: bf16[128,128], index: 1, kind: input, shape index: {}]   ;;  %s2168_s2 = inlined_call_operand.vmem [shape: f32[1,128], index: 2, kind: input, shape index: {}]   ;;  %s2169_s3 = inlined_call_operand.hbm [shape: bf16[128,128], index: 3, kind: input, shape index: {}]   ;;  %s2170_s4 = inlined_call_operand.vmem [shape: f32[1,128], index: 4, kind: input, shape index: {}]   ;;  %s2171_s5 = inlined_call_operand.hbm [shape: bf16[128,128], index: 5, kind: input, shape index: {}]   ;;  %s2172_s6 = inlined_call_operand.vmem [shape: f32[1,128], index: 6, kind: input, shape index: {}]   ;;  %s2173_s7 = inlined_call_operand.hbm [shape: bf16[128,128], index: 7, kind: input, shape index: {}]   ;;  %s2174_s8 = inlined_call_operand.vmem [shape: f32[1,128], index: 8, kind: input, shape index: {}]   ;;  %s2175_s9 = inlined_call_operand.hbm [shape: bf16[128,128], index: 9, kind: input, shape index: {}]   ;;  %s2176_s10 = inlined_call_operand.vmem [shape: f32[1,128], index: 10, kind: input, shape index: {}]   ;;  %s2177_s11 = inlined_call_operand.hbm [shape: bf16[128,128], index: 11, kind: input, shape index: {}]   ;;  %s2178_s12 = inlined_call_operand.vmem [shape: f32[1,128], index: 12, kind: input, shape index: {}]   ;;  %s2179_s13 = inlined_call_operand.hbm [shape: bf16[128,128], index: 13, kind: input, shape index: {}]   ;;  %s2180_s14 = inlined_call_operand.vmem [shape: f32[1,128], index: 14, kind: input, shape index: {}]   ;;  %s2181_s15 = inlined_call_operand.hbm [shape: bf16[128,128], index: 15, kind: input, shape index: {}]   ;;  %s2182_s16 = inlined_call_operand.vmem [shape: f32[1,128], index: 16, kind: input, shape index: {}]   ;;  %s2183_s17 = inlined_call_operand.hbm [shape: f32[16,256], index: 17, kind: output, shape index: {}]  }
   0x1   :  { %2187 = sst [smem:[#allocation24_spill]] %s2166_s0 }
   0x2   :  { %2188 = sst [smem:[#allocation25_spill]] %s2167_s1 }
   0x3   :  { %2189 = sst [smem:[#allocation26_spill]] %s2183_s17 }
   0x4   :  { %22 = vsyncpa [#allocation3], 0 }
   0x5   :  { %23 = vsyncpa [#allocation6], 0 }
   0x6   :  { %24 = vsyncpa [#allocation9], 0 }
   0x7   :  { %25 = vsyncpa [#allocation12], 0 }
   0x8   :  { %26 = vsyncpa [#allocation15], 0 }
   0x9   :  { %27 = vsyncpa [#allocation4], 0  ;;  %s1781_s24 = smov [#allocation5]   ;;  %s1782_s26 = smov [#allocation8]  }
   0xa   :  { %s45_s25 = sshll.u32 %s1781_s24, 4  ;;  %s73_s27 = sshll.u32 %s1782_s26, 4  ;;  %s46_s25 = int_to_ptr.vmem [resolvable:$true] %s45_s25  ;;  %s1887_s27 = int_to_ptr.vmem [resolvable:$true] %s73_s27 }
   0xb   :  { %s2190_s0 = sld [smem:[#allocation25_spill]] }
  0x11   :  { %s1549_s30 = scalar_lea.hbm %s2190_s0, 1024 }
  0x12   :  { %p1550_p0 = scmp.ne.s32.totalorder %s2190_s0, %s1549_s30  ;;  %p1553_p1 = scmp.lt.u32.totalorder %s1549_s30, %s2190_s0 }
  0x14   :  { %p1555_p2 = pnand %p1553_p1, %p1550_p0 }
  0x16   :  { %1558 = shalt.err (!%p1555_p2)
}
  0x17   :  { %s1559_s21 = scalar_lea.vmem %s46_s25, 1024  ;;  %p1564_p4 = scmp.lt.s32.totalorder %s46_s25, %s46_s25 }
  0x18   :  { %p1560_p3 = scmp.ne.s32.totalorder %s46_s25, %s1559_s21  ;;  %p1565_p5 = scmp.lt.s32.totalorder %s1559_s21, %s1559_s21 }
  0x1a   :  { %p1566_p6 = por %p1565_p5, %p1564_p4 }
  0x1c   :  { %p1567_p7 = pnand %p1566_p6, %p1560_p3 }
  0x1e   :  { %1570 = shalt.err (!%p1567_p7)
}
  0x1f   :  { %s1783_s22 = smov 64   ;;  %s1784_s23 = smov 4  }
  0x20   :  { %51 = dma.hbm_to_vmem [thread:$0]  %s2190_s0, 1024, %s46_s25, [#allocation6], %s1783_s22, %s1783_s22, %s1784_s23  }
  0x21   :  { %s1571_s30 = scalar_lea.hbm %s2171_s5, 1024 }
  0x22   :  { %p1572_p8 = scmp.ne.s32.totalorder %s2171_s5, %s1571_s30  ;;  %p1575_p9 = scmp.lt.u32.totalorder %s1571_s30, %s2171_s5 }
  0x24   :  { %p1577_p10 = pnand %p1575_p9, %p1572_p8 }
  0x26   :  { %1580 = shalt.err (!%p1577_p10)
}
  0x27   :  { %s1581_s21 = scalar_lea.vmem %s1887_s27, 1024  ;;  %p1586_p12 = scmp.lt.s32.totalorder %s1887_s27, %s1887_s27 }
  0x28   :  { %p1582_p11 = scmp.ne.s32.totalorder %s1887_s27, %s1581_s21  ;;  %p1587_p13 = scmp.lt.s32.totalorder %s1581_s21, %s1581_s21 }
  0x2a   :  { %p1588_p0 = por %p1587_p13, %p1586_p12 }
  0x2c   :  { %p1589_p1 = pnand %p1588_p0, %p1582_p11 }
  0x2e   :  { %1592 = shalt.err (!%p1589_p1)
}
  0x2f   :  { %79 = dma.hbm_to_vmem [thread:$0]  %s2171_s5, 1024, %s1887_s27, [#allocation9], %s1783_s22, %s1783_s22, %s1784_s23  }
  0x30   :  { %s1785_s24 = smov [#allocation11]   ;;  %s1786_s28 = smov [#allocation14]  }
  0x31   :  { %s101_s26 = sshll.u32 %s1785_s24, 4  ;;  %s129_s29 = sshll.u32 %s1786_s28, 4  ;;  %s102_s26 = int_to_ptr.vmem [resolvable:$true] %s101_s26  ;;  %s1924_s29 = int_to_ptr.vmem [resolvable:$true] %s129_s29 }
  0x32   :  { %s1593_s19 = scalar_lea.hbm %s2175_s9, 1024 }
  0x33   :  { %p1594_p2 = scmp.ne.s32.totalorder %s2175_s9, %s1593_s19  ;;  %p1597_p3 = scmp.lt.u32.totalorder %s1593_s19, %s2175_s9 }
  0x35   :  { %p1599_p4 = pnand %p1597_p3, %p1594_p2 }
  0x37   :  { %1602 = shalt.err (!%p1599_p4)
}
  0x38   :  { %s1603_s5 = scalar_lea.vmem %s102_s26, 1024  ;;  %p1608_p6 = scmp.lt.s32.totalorder %s102_s26, %s102_s26 }
  0x39   :  { %p1604_p5 = scmp.ne.s32.totalorder %s102_s26, %s1603_s5  ;;  %p1609_p7 = scmp.lt.s32.totalorder %s1603_s5, %s1603_s5 }
  0x3b   :  { %p1610_p8 = por %p1609_p7, %p1608_p6 }
  0x3d   :  { %p1611_p9 = pnand %p1610_p8, %p1604_p5 }
  0x3f   :  { %1614 = shalt.err (!%p1611_p9)
}
  0x40   :  { %107 = dma.hbm_to_vmem [thread:$0]  %s2175_s9, 1024, %s102_s26, [#allocation12], %s1783_s22, %s1783_s22, %s1784_s23  }
  0x41   :  { %s1615_s17 = scalar_lea.hbm %s2179_s13, 1024 }
  0x42   :  { %p1616_p10 = scmp.ne.s32.totalorder %s2179_s13, %s1615_s17  ;;  %p1619_p11 = scmp.lt.u32.totalorder %s1615_s17, %s2179_s13 }
  0x44   :  { %p1621_p12 = pnand %p1619_p11, %p1616_p10 }
  0x46   :  { %1624 = shalt.err (!%p1621_p12)
}
  0x47   :  { %s1625_s1 = scalar_lea.vmem %s1924_s29, 1024  ;;  %p1630_p0 = scmp.lt.s32.totalorder %s1924_s29, %s1924_s29 }
  0x48   :  { %p1626_p13 = scmp.ne.s32.totalorder %s1924_s29, %s1625_s1  ;;  %p1631_p1 = scmp.lt.s32.totalorder %s1625_s1, %s1625_s1 }
  0x4a   :  { %p1632_p2 = por %p1631_p1, %p1630_p0 }
  0x4c   :  { %p1633_p3 = pnand %p1632_p2, %p1626_p13 }
  0x4e   :  { %1636 = shalt.err (!%p1633_p3)
}
  0x4f   :  { %135 = dma.hbm_to_vmem [thread:$0]  %s2179_s13, 1024, %s1924_s29, [#allocation15], %s1783_s22, %s1783_s22, %s1784_s23  }
  0x50   :  { %s1787_s20 = smov [#allocation2]   ;;  %s1788_s5 = smov [#allocation7]  }
  0x51   :  { %s33_s21 = sshll.u32 %s1787_s20, 4  ;;  %s59_s27 = sshll.u32 %s1788_s5, 4  ;;  %s34_s21 = int_to_ptr.vmem [resolvable:$true] %s33_s21  ;;  %s1961_s27 = int_to_ptr.vmem [resolvable:$true] %s59_s27 }
  0x52   :  { %s2191_s24 = sld [smem:[#allocation24_spill]] }
  0x58   :  { %s1637_s17 = scalar_lea.hbm %s2191_s24, 128 }
  0x59   :  { %p1638_p4 = scmp.ne.s32.totalorder %s2191_s24, %s1637_s17  ;;  %p1641_p5 = scmp.lt.u32.totalorder %s1637_s17, %s2191_s24 }
  0x5b   :  { %p1643_p6 = pnand %p1641_p5, %p1638_p4 }
  0x5d   :  { %1646 = shalt.err (!%p1643_p6)
}
  0x5e   :  { %s1647_s13 = scalar_lea.vmem %s34_s21, 128  ;;  %p1652_p8 = scmp.lt.s32.totalorder %s34_s21, %s34_s21 }
  0x5f   :  { %p1648_p7 = scmp.ne.s32.totalorder %s34_s21, %s1647_s13  ;;  %p1653_p9 = scmp.lt.s32.totalorder %s1647_s13, %s1647_s13 }
  0x61   :  { %p1654_p10 = por %p1653_p9, %p1652_p8 }
  0x63   :  { %p1655_p11 = pnand %p1654_p10, %p1648_p7 }
  0x65   :  { %1658 = shalt.err (!%p1655_p11)
}
  0x66   :  { %39 = dma.hbm_to_vmem [thread:$0]  %s2191_s24, 128, %s34_s21, [#allocation3], %s1783_s22, %s1783_s22, %s1784_s23  }
  0x67   :  { %s1659_s20 = scalar_lea.hbm %s2169_s3, 1024 }
  0x68   :  { %p1660_p12 = scmp.ne.s32.totalorder %s2169_s3, %s1659_s20  ;;  %p1663_p13 = scmp.lt.u32.totalorder %s1659_s20, %s2169_s3 }
  0x6a   :  { %p1665_p0 = pnand %p1663_p13, %p1660_p12 }
  0x6c   :  { %1668 = shalt.err (!%p1665_p0)
}
  0x6d   :  { %s1669_s28 = scalar_lea.vmem %s1961_s27, 1024  ;;  %p1674_p2 = scmp.lt.s32.totalorder %s1961_s27, %s1961_s27 }
  0x6e   :  { %p1670_p1 = scmp.ne.s32.totalorder %s1961_s27, %s1669_s28  ;;  %p1675_p3 = scmp.lt.s32.totalorder %s1669_s28, %s1669_s28 }
  0x70   :  { %p1676_p4 = por %p1675_p3, %p1674_p2 }
  0x72   :  { %p1677_p5 = pnand %p1676_p4, %p1670_p1 }
  0x74   :  { %1680 = shalt.err (!%p1677_p5)
}
  0x75   :  { %65 = dma.hbm_to_vmem [thread:$0]  %s2169_s3, 1024, %s1961_s27, [#allocation6], %s1783_s22, %s1783_s22, %s1784_s23  }
  0x76   :  { %s1789_s30 = smov [#allocation10]   ;;  %s1790_s19 = smov [#allocation13]  }
  0x77   :  { %s87_s18 = sshll.u32 %s1789_s30, 4  ;;  %s115_s13 = sshll.u32 %s1790_s19, 4  ;;  %s88_s18 = int_to_ptr.vmem [resolvable:$true] %s87_s18  ;;  %s1998_s13 = int_to_ptr.vmem [resolvable:$true] %s115_s13 }
  0x78   :  { %s1681_s9 = scalar_lea.hbm %s2173_s7, 1024 }
  0x79   :  { %p1682_p6 = scmp.ne.s32.totalorder %s2173_s7, %s1681_s9  ;;  %p1685_p7 = scmp.lt.u32.totalorder %s1681_s9, %s2173_s7 }
  0x7b   :  { %p1687_p8 = pnand %p1685_p7, %p1682_p6 }
  0x7d   :  { %1690 = shalt.err (!%p1687_p8)
}
  0x7e   :  { %s1691_s3 = scalar_lea.vmem %s88_s18, 1024  ;;  %p1696_p10 = scmp.lt.s32.totalorder %s88_s18, %s88_s18 }
  0x7f   :  { %p1692_p9 = scmp.ne.s32.totalorder %s88_s18, %s1691_s3  ;;  %p1697_p11 = scmp.lt.s32.totalorder %s1691_s3, %s1691_s3 }
  0x81   :  { %p1698_p12 = por %p1697_p11, %p1696_p10 }
  0x83   :  { %p1699_p13 = pnand %p1698_p12, %p1692_p9 }
  0x85   :  { %1702 = shalt.err (!%p1699_p13)
}
  0x86   :  { %93 = dma.hbm_to_vmem [thread:$0]  %s2173_s7, 1024, %s88_s18, [#allocation9], %s1783_s22, %s1783_s22, %s1784_s23  }
  0x87   :  { %s1703_s21 = scalar_lea.hbm %s2177_s11, 1024 }
  0x88   :  { %p1704_p0 = scmp.ne.s32.totalorder %s2177_s11, %s1703_s21  ;;  %p1707_p1 = scmp.lt.u32.totalorder %s1703_s21, %s2177_s11 }
  0x8a   :  { %p1709_p2 = pnand %p1707_p1, %p1704_p0 }
  0x8c   :  { %1712 = shalt.err (!%p1709_p2)
}
  0x8d   :  { %s1713_s1 = scalar_lea.vmem %s1998_s13, 1024  ;;  %p1718_p4 = scmp.lt.s32.totalorder %s1998_s13, %s1998_s13 }
  0x8e   :  { %p1714_p3 = scmp.ne.s32.totalorder %s1998_s13, %s1713_s1  ;;  %p1719_p5 = scmp.lt.s32.totalorder %s1713_s1, %s1713_s1 }
  0x90   :  { %p1720_p6 = por %p1719_p5, %p1718_p4 }
  0x92   :  { %p1721_p7 = pnand %p1720_p6, %p1714_p3 }
  0x94   :  { %1724 = shalt.err (!%p1721_p7)
}
  0x95   :  { %121 = dma.hbm_to_vmem [thread:$0]  %s2177_s11, 1024, %s1998_s13, [#allocation12], %s1783_s22, %s1783_s22, %s1784_s23  }
  0x96   :  { %s1791_s9 = smov [#allocation16]   ;;  %s1725_s25 = scalar_lea.hbm %s2181_s15, 1024 }
  0x97   :  { %s143_s26 = sshll.u32 %s1791_s9, 4  ;;  %p1726_p8 = scmp.ne.s32.totalorder %s2181_s15, %s1725_s25  ;;  %s144_s26 = int_to_ptr.vmem [resolvable:$true] %s143_s26 }
  0x98   :  { %p1729_p9 = scmp.lt.u32.totalorder %s1725_s25, %s2181_s15 }
  0x9a   :  { %p1731_p10 = pnand %p1729_p9, %p1726_p8 }
  0x9c   :  { %1734 = shalt.err (!%p1731_p10)
}
  0x9d   :  { %s1735_s28 = scalar_lea.vmem %s144_s26, 1024  ;;  %p1740_p12 = scmp.lt.s32.totalorder %s144_s26, %s144_s26 }
  0x9e   :  { %p1736_p11 = scmp.ne.s32.totalorder %s144_s26, %s1735_s28  ;;  %p1741_p13 = scmp.lt.s32.totalorder %s1735_s28, %s1735_s28 }
  0xa0   :  { %p1742_p0 = por %p1741_p13, %p1740_p12 }
  0xa2   :  { %p1743_p1 = pnand %p1742_p0, %p1736_p11 }
  0xa4   :  { %1746 = shalt.err (!%p1743_p1)
}
  0xa5   :  { %149 = dma.hbm_to_vmem [thread:$0]  %s2181_s15, 1024, %s144_s26, [#allocation15], %s1783_s22, %s1783_s22, %s1784_s23  }
  0xa6   :  { %1769 = dma.done.wait [#allocation3], 128  }
  0xa7   :  { %1770 = vsyncadd [#allocation3], 4294967168 }
  0xa8   :  { %1771 = dma.done.wait [#allocation6], 2048  }
  0xa9   :  { %1772 = vsyncadd [#allocation6], 4294965248 }
  0xaa   :  { %1773 = dma.done.wait [#allocation9], 2048  }
  0xab   :  { %1774 = vsyncadd [#allocation9], 4294965248 }
  0xac   :  { %1775 = dma.done.wait [#allocation12], 2048  }
  0xad   :  { %1776 = vsyncadd [#allocation12], 4294965248 }
  0xae   :  { %1777 = dma.done.wait [#allocation15], 2048  }
  0xaf   :  { %1778 = vsyncadd [#allocation15], 4294965248  ;;  %v1792_v0 = vmov 0.0   ;;  %vm1793_vm0 = vmmov 0   ;;  %v1468_v1 = vld [vmem:[#allocation5] sm:$0xff]   ;;  %v1469_v2 = vld [vmem:[#allocation5 + $0x8] sm:$0xff]  }
  0xb0   :  { %1292 = vmatprep.subr.bf16.mxu0 %v1792_v0  ;;  %1308 = vmatprep.mubr.msk.bf16.mxu0 %vm1793_vm0, %v1792_v0  ;;  %v1470_v3 = vld [vmem:[#allocation5 + $0x10] sm:$0xff]   ;;  %v1471_v4 = vld [vmem:[#allocation5 + $0x18] sm:$0xff]   ;;  %v1472_v5 = vld [vmem:[#allocation5 + $0x20] sm:$0xff]   ;;  %s1794_s18 = smov [#allocation17]  }
  0xb1   :  { %1312 = vmatprep.subr.bf16.mxu1 %v1792_v0  ;;  %1328 = vmatprep.mubr.msk.bf16.mxu1 %vm1793_vm0, %v1792_v0  ;;  %v1473_v6 = vld [vmem:[#allocation5 + $0x28] sm:$0xff]   ;;  %v1474_v7 = vld [vmem:[#allocation5 + $0x30] sm:$0xff]   ;;  %v1475_v8 = vld [vmem:[#allocation5 + $0x38] sm:$0xff]   ;;  %s1127_s9 = sshll.u32 %s1794_s18, 4  ;;  %s1128_s9 = int_to_ptr.vmem [resolvable:$true] %s1127_s9 }
  0xb2   :  { %1293 = vmatpush3.bf16.msra.mxu0 %v1468_v1  ;;  %v1476_v9 = vld [vmem:[#allocation2] sm:$0xff]   ;;  %v1477_v10 = vld [vmem:[#allocation7] sm:$0xff]   ;;  %v1478_v11 = vld [vmem:[#allocation7 + $0x8] sm:$0xff]   ;;  %p1752_p3 = scmp.lt.s32.totalorder %s1128_s9, %s1128_s9 }
  0xb3   :  { %1294 = vmatprep.subr.bf16.mxu0 %v1792_v0  ;;  %1313 = vmatpush3.bf16.msra.mxu1 %v1477_v10  ;;  %v1479_v12 = vld [vmem:[#allocation7 + $0x10] sm:$0xff]   ;;  %v1480_v13 = vld [vmem:[#allocation7 + $0x18] sm:$0xff]   ;;  %v1481_v14 = vld [vmem:[#allocation7 + $0x20] sm:$0xff]  }
  0xb4   :  { %1314 = vmatprep.subr.bf16.mxu1 %v1792_v0  ;;  %v1482_v15 = vld [vmem:[#allocation7 + $0x28] sm:$0xff]   ;;  %v1483_v16 = vld [vmem:[#allocation7 + $0x30] sm:$0xff]   ;;  %v1484_v17 = vld [vmem:[#allocation7 + $0x38] sm:$0xff]  }
  0xb5   :  { %v1143_v18 = vld [vmem:[%s2168_s2] ss:$0 sm:$0xff]  ;;  %v1485_v36 = vld [vmem:[#allocation8] sm:$0xff]   ;;  %v1486_v37 = vld [vmem:[#allocation8 + $0x8] sm:$0xff]  }
  0xb6   :  { %1295 = vmatpush3.bf16.msra.mxu0 %v1469_v2  ;;  %v1487_v38 = vld [vmem:[#allocation8 + $0x10] sm:$0xff]   ;;  %v1488_v39 = vld [vmem:[#allocation8 + $0x18] sm:$0xff]   ;;  %v1489_v40 = vld [vmem:[#allocation8 + $0x20] sm:$0xff]  }
  0xb7   :  { %1296 = vmatprep.subr.bf16.mxu0 %v1792_v0  ;;  %1315 = vmatpush3.bf16.msra.mxu1 %v1478_v11  ;;  %v1490_v41 = vld [vmem:[#allocation8 + $0x28] sm:$0xff]   ;;  %v1491_v42 = vld [vmem:[#allocation8 + $0x30] sm:$0xff]   ;;  %v1492_v43 = vld [vmem:[#allocation8 + $0x38] sm:$0xff]  }
  0xb8   :  { %1316 = vmatprep.subr.bf16.mxu1 %v1792_v0  ;;  %v1493_v44 = vld [vmem:[#allocation10] sm:$0xff]   ;;  %v1494_v45 = vld [vmem:[#allocation10 + $0x8] sm:$0xff]   ;;  %v1495_v46 = vld [vmem:[#allocation10 + $0x10] sm:$0xff]  }
  0xb9   :  { %v1496_v47 = vld [vmem:[#allocation10 + $0x18] sm:$0xff]   ;;  %v1497_v48 = vld [vmem:[#allocation10 + $0x20] sm:$0xff]   ;;  %v1498_v49 = vld [vmem:[#allocation10 + $0x28] sm:$0xff]  }
  0xba   :  { %1297 = vmatpush3.bf16.msra.mxu0 %v1470_v3  ;;  %v1499_v50 = vld [vmem:[#allocation10 + $0x30] sm:$0xff]   ;;  %v1155_v51 = vld [vmem:[%s2170_s4] ss:$0 sm:$0xff]  ;;  %v1513_v11 = vld [vmem:[#allocation11 + $0x20] sm:$0xff]  }
  0xbb   :  { %1298 = vmatprep.subr.bf16.mxu0 %v1792_v0  ;;  %1317 = vmatpush3.bf16.msra.mxu1 %v1479_v12  ;;  %v1512_v10 = vld [vmem:[#allocation11 + $0x18] sm:$0xff]   ;;  %v1514_v12 = vld [vmem:[#allocation11 + $0x28] sm:$0xff]  }
  0xbc   :  { %1318 = vmatprep.subr.bf16.mxu1 %v1792_v0 }
  0xbe   :  { %1299 = vmatpush3.bf16.msra.mxu0 %v1471_v4 }
  0xbf   :  { %1300 = vmatprep.subr.bf16.mxu0 %v1792_v0  ;;  %1319 = vmatpush3.bf16.msra.mxu1 %v1480_v13  ;;  %v1515_v13 = vld [vmem:[#allocation11 + $0x30] sm:$0xff]  }
  0xc0   :  { %1320 = vmatprep.subr.bf16.mxu1 %v1792_v0 }
  0xc2   :  { %1301 = vmatpush3.bf16.msra.mxu0 %v1472_v5 }
  0xc3   :  { %1302 = vmatprep.subr.bf16.mxu0 %v1792_v0  ;;  %1321 = vmatpush3.bf16.msra.mxu1 %v1481_v14  ;;  %v1166_v14 = vld [vmem:[%s2172_s6] ss:$0 sm:$0xff] }
  0xc4   :  { %1322 = vmatprep.subr.bf16.mxu1 %v1792_v0 }
  0xc6   :  { %1303 = vmatpush3.bf16.msra.mxu0 %v1473_v6  ;;  %v1500_v6 = vld [vmem:[#allocation10 + $0x38] sm:$0xff]  }
  0xc7   :  { %1304 = vmatprep.subr.bf16.mxu0 %v1792_v0  ;;  %1323 = vmatpush3.bf16.msra.mxu1 %v1482_v15 }
  0xc8   :  { %1324 = vmatprep.subr.bf16.mxu1 %v1792_v0 }
  0xca   :  { %1305 = vmatpush3.bf16.msra.mxu0 %v1474_v7  ;;  %v1509_v7 = vld [vmem:[#allocation11] sm:$0xff]  }
  0xcb   :  { %1306 = vmatprep.subr.bf16.mxu0 %v1792_v0  ;;  %1325 = vmatpush3.bf16.msra.mxu1 %v1483_v16 }
  0xcc   :  { %1326 = vmatprep.subr.bf16.mxu1 %v1792_v0 }
  0xce   :  { %1307 = vmatpush3.bf16.msra.mxu0 %v1475_v8  ;;  %v1510_v8 = vld [vmem:[#allocation11 + $0x8] sm:$0xff]  }
  0xcf   :  { %1332 = vmatprep.subr.bf16.mxu0 %v1792_v0  ;;  %1327 = vmatpush3.bf16.msra.mxu1 %v1484_v17 }
  0xd0   :  { %1352 = vmatprep.subr.bf16.mxu1 %v1792_v0 }
  0xd1   :  { %1309 = vmatmul.mubr.bf16.vlgmr.msra.gmra.mrb[0].mxu0 %v1476_v9  ;;  %v1511_v9 = vld [vmem:[#allocation11 + $0x10] sm:$0xff]  }
  0xd2   :  { %1348 = vmatprep.mubr.msk.bf16.mxu0 %vm1793_vm0, %v1792_v0  ;;  %1333 = vmatpush3.bf16.msra.mxu0 %v1485_v36 }
  0xd3   :  { %1334 = vmatprep.subr.bf16.mxu0 %v1792_v0 }
  0xd6   :  { %1335 = vmatpush3.bf16.msra.mxu0 %v1486_v37 }
  0xd7   :  { %1336 = vmatprep.subr.bf16.mxu0 %v1792_v0 }
  0xda   :  { %1337 = vmatpush3.bf16.msra.mxu0 %v1487_v38  ;;  %v1517_v38 = vld [vmem:[#allocation14] sm:$0xff]  }
  0xdb   :  { %1338 = vmatprep.subr.bf16.mxu0 %v1792_v0 }
  0xde   :  { %1339 = vmatpush3.bf16.msra.mxu0 %v1488_v39 }
  0xdf   :  { %1340 = vmatprep.subr.bf16.mxu0 %v1792_v0 }
  0xe2   :  { %1341 = vmatpush3.bf16.msra.mxu0 %v1489_v40  ;;  %v1518_v40 = vld [vmem:[#allocation14 + $0x8] sm:$0xff]  }
  0xe3   :  { %1342 = vmatprep.subr.bf16.mxu0 %v1792_v0 }
  0xe6   :  { %1343 = vmatpush3.bf16.msra.mxu0 %v1490_v41  ;;  %v1519_v41 = vld [vmem:[#allocation14 + $0x10] sm:$0xff]  }
  0xe7   :  { %1344 = vmatprep.subr.bf16.mxu0 %v1792_v0 }
  0xea   :  { %1345 = vmatpush3.bf16.msra.mxu0 %v1491_v42  ;;  %v1520_v42 = vld [vmem:[#allocation14 + $0x18] sm:$0xff]  }
  0xeb   :  { %1346 = vmatprep.subr.bf16.mxu0 %v1792_v0 }
  0xee   :  { %1347 = vmatpush3.bf16.msra.mxu0 %v1492_v43  ;;  %v1521_v43 = vld [vmem:[#allocation14 + $0x20] sm:$0xff]  }
  0xef   :  { %1372 = vmatprep.subr.bf16.mxu0 %v1792_v0 }
 0x1a4   :  { %v293_v19 = vpop.f32.mrb[0].mxu0 }
 0x1a5   :  { %v294_v20 = vadd.f32 %v1143_v18, %v293_v19  ;;  %v1310_v21 = vpop.f32.mrb[1].mxu0 }
 0x1a6   :  { %v296_v22 = vpop.f32.mrb[2].mxu0  ;;  %v1501_v21 = vld [vmem:[#allocation13] sm:$0xff]  }
 0x1a7   :  { %v1153_v23 = vmul.f32 -1.442695, %v294_v20  ;;  %v297_v24 = vadd.f32 %v1143_v18, %v296_v22  ;;  %v1311_v25 = vpop.f32.mrb[3].mxu0 }
 0x1a8   :  { %v1504_v25 = vld [vmem:[#allocation13 + $0x18] sm:$0xff]  }
 0x1a9   :  { %1533 = vpow2.f32 %v1153_v23  ;;  %v1154_v26 = vmul.f32 -1.442695, %v297_v24  ;;  %v1502_v23 = vld [vmem:[#allocation13 + $0x8] sm:$0xff]  }
 0x1ab   :  { %1535 = vpow2.f32 %v1154_v26  ;;  %v1505_v26 = vld [vmem:[#allocation13 + $0x20] sm:$0xff]  }
 0x1b3   :  { %v1534_v27 = vpop.eup %1533 }
 0x1b4   :  { %v306_v28 = vadd.f32 1.0, %v1534_v27  ;;  %v1506_v27 = vld [vmem:[#allocation13 + $0x28] sm:$0xff]  }
 0x1b5   :  { %v1536_v29 = vpop.eup %1535 }
 0x1b6   :  { %1537 = vrcp.f32 %v306_v28  ;;  %v307_v30 = vadd.f32 1.0, %v1536_v29  ;;  %v1507_v28 = vld [vmem:[#allocation13 + $0x30] sm:$0xff]   ;;  %v1508_v29 = vld [vmem:[#allocation13 + $0x38] sm:$0xff]  }
 0x1b8   :  { %1539 = vrcp.f32 %v307_v30  ;;  %v1516_v30 = vld [vmem:[#allocation11 + $0x38] sm:$0xff]  }
 0x1c0   :  { %v1538_v31 = vpop.eup %1537 }
 0x1c1   :  { %v312_v33 = vmul.f32 %v1538_v31, %v294_v20  ;;  %v1175_v31 = vld [vmem:[%s2174_s8] ss:$0 sm:$0xff] }
 0x1c2   :  { %v1540_v32 = vpop.eup %1539 }
 0x1c3   :  { %v313_v34 = vmul.f32 %v1540_v32, %v297_v24  ;;  %v1503_v24 = vld [vmem:[#allocation13 + $0x10] sm:$0xff]  }
 0x1c5   :  { %v314_v35 = vpack.c.bf16 %v313_v34, %v312_v33 }
 0x1c7   :  { %1329 = vmatmul.mubr.bf16.vlgmr.msra.gmra.mrb[0].mxu1 %v314_v35 }
 0x1c8   :  { %1368 = vmatprep.mubr.msk.bf16.mxu1 %vm1793_vm0, %v1792_v0  ;;  %1353 = vmatpush3.bf16.msra.mxu1 %v1493_v44  ;;  %v1522_v44 = vld [vmem:[#allocation14 + $0x28] sm:$0xff]  }
 0x1c9   :  { %1354 = vmatprep.subr.bf16.mxu1 %v1792_v0 }
 0x1cc   :  { %1355 = vmatpush3.bf16.msra.mxu1 %v1494_v45  ;;  %v1523_v45 = vld [vmem:[#allocation14 + $0x30] sm:$0xff]  }
 0x1cd   :  { %1356 = vmatprep.subr.bf16.mxu1 %v1792_v0 }
 0x1d0   :  { %1357 = vmatpush3.bf16.msra.mxu1 %v1495_v46  ;;  %v1193_v46 = vld [vmem:[%s2178_s12] ss:$0 sm:$0xff] }
 0x1d1   :  { %1358 = vmatprep.subr.bf16.mxu1 %v1792_v0 }
 0x1d4   :  { %1359 = vmatpush3.bf16.msra.mxu1 %v1496_v47 }
 0x1d5   :  { %1360 = vmatprep.subr.bf16.mxu1 %v1792_v0 }
 0x1d8   :  { %1361 = vmatpush3.bf16.msra.mxu1 %v1497_v48  ;;  %v1524_v48 = vld [vmem:[#allocation14 + $0x38] sm:$0xff]  }
 0x1d9   :  { %1362 = vmatprep.subr.bf16.mxu1 %v1792_v0 }
 0x1dc   :  { %1363 = vmatpush3.bf16.msra.mxu1 %v1498_v49 }
 0x1dd   :  { %1364 = vmatprep.subr.bf16.mxu1 %v1792_v0 }
 0x1e0   :  { %1365 = vmatpush3.bf16.msra.mxu1 %v1499_v50 }
 0x1e1   :  { %1366 = vmatprep.subr.bf16.mxu1 %v1792_v0 }
 0x1e4   :  { %1367 = vmatpush3.bf16.msra.mxu1 %v1500_v6 }
 0x1e5   :  { %1392 = vmatprep.subr.bf16.mxu1 %v1792_v0 }
 0x29a   :  { %v420_v52 = vpop.f32.mrb[0].mxu1 }
 0x29b   :  { %v421_v53 = vadd.f32 %v1155_v51, %v420_v52  ;;  %v1330_v54 = vpop.f32.mrb[1].mxu1 }
 0x29c   :  { %v423_v55 = vpop.f32.mrb[2].mxu1 }
 0x29d   :  { %v1164_v56 = vmul.f32 -1.442695, %v421_v53  ;;  %v424_v57 = vadd.f32 %v1155_v51, %v423_v55  ;;  %v1331_v58 = vpop.f32.mrb[3].mxu1  ;;  %v1525_v55 = vld [vmem:[#allocation16] sm:$0xff]  }
 0x29e   :  { %v1528_v58 = vld [vmem:[#allocation16 + $0x18] sm:$0xff]  }
 0x29f   :  { %1541 = vpow2.f32 %v1164_v56  ;;  %v1165_v59 = vmul.f32 -1.442695, %v424_v57  ;;  %v1526_v56 = vld [vmem:[#allocation16 + $0x8] sm:$0xff]  }
 0x2a1   :  { %1543 = vpow2.f32 %v1165_v59  ;;  %v1529_v59 = vld [vmem:[#allocation16 + $0x20] sm:$0xff]  }
 0x2a9   :  { %v1542_v60 = vpop.eup %1541 }
 0x2aa   :  { %v433_v61 = vadd.f32 1.0, %v1542_v60  ;;  %v1530_v60 = vld [vmem:[#allocation16 + $0x28] sm:$0xff]  }
 0x2ab   :  { %v1544_v62 = vpop.eup %1543 }
 0x2ac   :  { %1545 = vrcp.f32 %v433_v61  ;;  %v434_v63 = vadd.f32 1.0, %v1544_v62  ;;  %v1531_v61 = vld [vmem:[#allocation16 + $0x30] sm:$0xff]   ;;  %v1532_v62 = vld [vmem:[#allocation16 + $0x38] sm:$0xff]  }
 0x2ae   :  { %1547 = vrcp.f32 %v434_v63  ;;  %v1184_v63 = vld [vmem:[%s2176_s10] ss:$0 sm:$0xff] }
 0x2b6   :  { %v1546_v1 = vpop.eup %1545 }
 0x2b7   :  { %v439_v3 = vmul.f32 %v1546_v1, %v421_v53 }
 0x2b8   :  { %v1548_v2 = vpop.eup %1547 }
 0x2b9   :  { %v440_v4 = vmul.f32 %v1548_v2, %v424_v57  ;;  %v1527_v57 = vld [vmem:[#allocation16 + $0x10] sm:$0xff]  }
 0x2bb   :  { %v441_v5 = vpack.c.bf16 %v440_v4, %v439_v3 }
 0x2bd   :  { %1349 = vmatmul.mubr.bf16.vlgmr.msra.gmra.mrb[4].mxu0 %v441_v5 }
 0x2be   :  { %1388 = vmatprep.mubr.msk.bf16.mxu0 %vm1793_vm0, %v1792_v0  ;;  %1373 = vmatpush3.bf16.msra.mxu0 %v1509_v7  ;;  %v1202_v7 = vld [vmem:[%s2180_s14] ss:$0 sm:$0xff]  ;;  %s1747_s14 = scalar_lea.vmem %s1128_s9, 512 }
 0x2bf   :  { %1374 = vmatprep.subr.bf16.mxu0 %v1792_v0  ;;  %p1748_p2 = scmp.ne.s32.totalorder %s1128_s9, %s1747_s14  ;;  %p1753_p4 = scmp.lt.s32.totalorder %s1747_s14, %s1747_s14 }
 0x2c1   :  { %p1754_p5 = por %p1753_p4, %p1752_p3 }
 0x2c2   :  { %1375 = vmatpush3.bf16.msra.mxu0 %v1510_v8 }
 0x2c3   :  { %1376 = vmatprep.subr.bf16.mxu0 %v1792_v0  ;;  %p1755_p6 = pnand %p1754_p5, %p1748_p2 }
 0x2c6   :  { %1377 = vmatpush3.bf16.msra.mxu0 %v1511_v9 }
 0x2c7   :  { %1378 = vmatprep.subr.bf16.mxu0 %v1792_v0 }
 0x2ca   :  { %1379 = vmatpush3.bf16.msra.mxu0 %v1512_v10 }
 0x2cb   :  { %1380 = vmatprep.subr.bf16.mxu0 %v1792_v0 }
 0x2ce   :  { %1381 = vmatpush3.bf16.msra.mxu0 %v1513_v11 }
 0x2cf   :  { %1382 = vmatprep.subr.bf16.mxu0 %v1792_v0 }
 0x2d2   :  { %1383 = vmatpush3.bf16.msra.mxu0 %v1514_v12 }
 0x2d3   :  { %1384 = vmatprep.subr.bf16.mxu0 %v1792_v0 }
 0x2d6   :  { %1385 = vmatpush3.bf16.msra.mxu0 %v1515_v13 }
 0x2d7   :  { %1386 = vmatprep.subr.bf16.mxu0 %v1792_v0 }
 0x2da   :  { %1387 = vmatpush3.bf16.msra.mxu0 %v1516_v30 }
 0x2db   :  { %1412 = vmatprep.subr.bf16.mxu0 %v1792_v0 }
 0x390   :  { %v547_v15 = vpop.f32.mrb[4].mxu0 }
 0x391   :  { %v1350_v16 = vpop.f32.mrb[5].mxu0  ;;  %v548_v18 = vadd.f32 %v1166_v14, %v547_v15 }
 0x392   :  { %v550_v17 = vpop.f32.mrb[6].mxu0 }
 0x393   :  { %v551_v19 = vadd.f32 %v1166_v14, %v550_v17  ;;  %v1351_v20 = vpop.f32.mrb[7].mxu0  ;;  %v1211_v14 = vld [vmem:[%s2182_s16] ss:$0 sm:$0xff] }
 0x395   :  { %v554_v22 = vpack.c.bf16 %v551_v19, %v548_v18 }
 0x397   :  { %1369 = vmatmul.mubr.bf16.vlgmr.msra.gmra.mrb[4].mxu1 %v554_v22 }
 0x398   :  { %1393 = vmatpush3.bf16.msra.mxu1 %v1501_v21  ;;  %1408 = vmatprep.mubr.msk.bf16.mxu1 %vm1793_vm0, %v1792_v0 }
 0x399   :  { %1394 = vmatprep.subr.bf16.mxu1 %v1792_v0 }
 0x39c   :  { %1395 = vmatpush3.bf16.msra.mxu1 %v1502_v23 }
 0x39d   :  { %1396 = vmatprep.subr.bf16.mxu1 %v1792_v0 }
 0x3a0   :  { %1397 = vmatpush3.bf16.msra.mxu1 %v1503_v24 }
 0x3a1   :  { %1398 = vmatprep.subr.bf16.mxu1 %v1792_v0 }
 0x3a4   :  { %1399 = vmatpush3.bf16.msra.mxu1 %v1504_v25 }
 0x3a5   :  { %1400 = vmatprep.subr.bf16.mxu1 %v1792_v0 }
 0x3a8   :  { %1401 = vmatpush3.bf16.msra.mxu1 %v1505_v26 }
 0x3a9   :  { %1402 = vmatprep.subr.bf16.mxu1 %v1792_v0 }
 0x3ac   :  { %1403 = vmatpush3.bf16.msra.mxu1 %v1506_v27 }
 0x3ad   :  { %1404 = vmatprep.subr.bf16.mxu1 %v1792_v0 }
 0x3b0   :  { %1405 = vmatpush3.bf16.msra.mxu1 %v1507_v28 }
 0x3b1   :  { %1406 = vmatprep.subr.bf16.mxu1 %v1792_v0 }
 0x3b4   :  { %1407 = vmatpush3.bf16.msra.mxu1 %v1508_v29 }
 0x3b5   :  { %1432 = vmatprep.subr.bf16.mxu1 %v1792_v0 }
 0x3b7   :  { %1409 = vmatmul.mubr.bf16.vlgmr.msra.gmra.mrb[8].mxu1 %v441_v5 }
 0x3b8   :  { %1448 = vmatprep.mubr.msk.bf16.mxu1 %vm1793_vm0, %v1792_v0  ;;  %1433 = vmatpush3.bf16.msra.mxu1 %v1525_v55 }
 0x3b9   :  { %1434 = vmatprep.subr.bf16.mxu1 %v1792_v0 }
 0x3bc   :  { %1435 = vmatpush3.bf16.msra.mxu1 %v1526_v56 }
 0x3bd   :  { %1436 = vmatprep.subr.bf16.mxu1 %v1792_v0 }
 0x3c0   :  { %1437 = vmatpush3.bf16.msra.mxu1 %v1527_v57 }
 0x3c1   :  { %1438 = vmatprep.subr.bf16.mxu1 %v1792_v0 }
 0x3c4   :  { %1439 = vmatpush3.bf16.msra.mxu1 %v1528_v58 }
 0x3c5   :  { %1440 = vmatprep.subr.bf16.mxu1 %v1792_v0 }
 0x3c8   :  { %1441 = vmatpush3.bf16.msra.mxu1 %v1529_v59 }
 0x3c9   :  { %1442 = vmatprep.subr.bf16.mxu1 %v1792_v0 }
 0x3cc   :  { %1443 = vmatpush3.bf16.msra.mxu1 %v1530_v60 }
 0x3cd   :  { %1444 = vmatprep.subr.bf16.mxu1 %v1792_v0 }
 0x3d0   :  { %1445 = vmatpush3.bf16.msra.mxu1 %v1531_v61 }
 0x3d1   :  { %1446 = vmatprep.subr.bf16.mxu1 %v1792_v0 }
 0x3d4   :  { %1447 = vmatpush3.bf16.msra.mxu1 %v1532_v62 }
 0x46a   :  { %v660_v32 = vpop.f32.mrb[4].mxu1 }
 0x46b   :  { %v1370_v33 = vpop.f32.mrb[5].mxu1  ;;  %v661_v35 = vadd.f32 %v1175_v31, %v660_v32 }
 0x46c   :  { %v663_v34 = vpop.f32.mrb[6].mxu1 }
 0x46d   :  { %v664_v36 = vadd.f32 %v1175_v31, %v663_v34  ;;  %v1371_v37 = vpop.f32.mrb[7].mxu1 }
 0x46f   :  { %v667_v39 = vpack.c.bf16 %v664_v36, %v661_v35 }
 0x471   :  { %1389 = vmatmul.mubr.bf16.vlgmr.msra.gmra.mrb[8].mxu0 %v667_v39 }
 0x472   :  { %1413 = vmatpush3.bf16.msra.mxu0 %v1517_v38  ;;  %1428 = vmatprep.mubr.msk.bf16.mxu0 %vm1793_vm0, %v1792_v0 }
 0x473   :  { %1414 = vmatprep.subr.bf16.mxu0 %v1792_v0 }
 0x476   :  { %1415 = vmatpush3.bf16.msra.mxu0 %v1518_v40 }
 0x477   :  { %1416 = vmatprep.subr.bf16.mxu0 %v1792_v0 }
 0x47a   :  { %1417 = vmatpush3.bf16.msra.mxu0 %v1519_v41 }
 0x47b   :  { %1418 = vmatprep.subr.bf16.mxu0 %v1792_v0 }
 0x47e   :  { %1419 = vmatpush3.bf16.msra.mxu0 %v1520_v42 }
 0x47f   :  { %1420 = vmatprep.subr.bf16.mxu0 %v1792_v0 }
 0x482   :  { %1421 = vmatpush3.bf16.msra.mxu0 %v1521_v43 }
 0x483   :  { %1422 = vmatprep.subr.bf16.mxu0 %v1792_v0 }
 0x486   :  { %1423 = vmatpush3.bf16.msra.mxu0 %v1522_v44 }
 0x487   :  { %1424 = vmatprep.subr.bf16.mxu0 %v1792_v0 }
 0x48a   :  { %v887_v47 = vpop.f32.mrb[8].mxu1  ;;  %1425 = vmatpush3.bf16.msra.mxu0 %v1523_v45 }
 0x48b   :  { %v1410_v49 = vpop.f32.mrb[9].mxu1  ;;  %1426 = vmatprep.subr.bf16.mxu0 %v1792_v0  ;;  %v888_v51 = vadd.f32 %v1193_v46, %v887_v47 }
 0x48c   :  { %v890_v50 = vpop.f32.mrb[10].mxu1 }
 0x48d   :  { %v891_v52 = vadd.f32 %v1193_v46, %v890_v50  ;;  %v1411_v53 = vpop.f32.mrb[11].mxu1 }
 0x48e   :  { %1427 = vmatpush3.bf16.msra.mxu0 %v1524_v48 }
 0x48f   :  { %v894_v54 = vpack.c.bf16 %v891_v52, %v888_v51 }
 0x491   :  { %1429 = vmatmul.mubr.bf16.vlgmr.msra.gmra.mrb[12].mxu0 %v894_v54 }
 0x544   :  { %v773_v1 = vpop.f32.mrb[8].mxu0 }
 0x545   :  { %v774_v2 = vadd.f32 %v1184_v63, %v773_v1  ;;  %v1390_v3 = vpop.f32.mrb[9].mxu0 }
 0x546   :  { %v776_v4 = vpop.f32.mrb[10].mxu0 }
 0x547   :  { %780 = vst [vmem:[#allocation17] sm:$0xff] %v774_v2  ;;  %v777_v5 = vadd.f32 %v1184_v63, %v776_v4  ;;  %v1391_v6 = vpop.f32.mrb[11].mxu0 }
 0x549   :  { %781 = vst [vmem:[#allocation17 + $0x10] sm:$0xff] %v777_v5 }
 0x564   :  { %v1000_v8 = vpop.f32.mrb[12].mxu0 }
 0x565   :  { %v1430_v0 = vpop.f32.mrb[13].mxu0  ;;  %v1001_v10 = vadd.f32 %v1202_v7, %v1000_v8 }
 0x566   :  { %v1003_v9 = vpop.f32.mrb[14].mxu0 }
 0x567   :  { %v1004_v11 = vadd.f32 %v1202_v7, %v1003_v9  ;;  %v1431_v12 = vpop.f32.mrb[15].mxu0 }
 0x569   :  { %v1007_v13 = vpack.c.bf16 %v1004_v11, %v1001_v10 }
 0x56b   :  { %1449 = vmatmul.mubr.bf16.vlgmr.msra.gmra.mrb[12].mxu1 %v1007_v13 }
 0x63e   :  { %v1113_v15 = vpop.f32.mrb[12].mxu1 }
 0x63f   :  { %v1114_v16 = vadd.f32 %v1211_v14, %v1113_v15  ;;  %v1450_v17 = vpop.f32.mrb[13].mxu1 }
 0x640   :  { %v1116_v18 = vpop.f32.mrb[14].mxu1 }
 0x641   :  { %1120 = vst [vmem:[#allocation17 + $0x8] sm:$0xff] %v1114_v16  ;;  %v1117_v19 = vadd.f32 %v1211_v14, %v1116_v18  ;;  %v1451_v20 = vpop.f32.mrb[15].mxu1 }
 0x643   :  { %1121 = vst [vmem:[#allocation17 + $0x18] sm:$0xff] %v1117_v19 }
 0x644   :  { %1758 = shalt.err (!%p1755_p6)
}
 0x645   :  { %s2192_s20 = sld [smem:[#allocation26_spill]] }
 0x64b   :  { %s1759_s5 = scalar_lea.hbm %s2192_s20, 512 }
 0x64c   :  { %p1760_p7 = scmp.ne.s32.totalorder %s2192_s20, %s1759_s5  ;;  %p1763_p8 = scmp.lt.u32.totalorder %s1759_s5, %s2192_s20 }
 0x64e   :  { %p1765_p9 = pnand %p1763_p8, %p1760_p7 }
 0x650   :  { %1768 = shalt.err (!%p1765_p9)
}
 0x651   :  { %s1795_s17 = smov 256   ;;  %s1796_s28 = smov 16  }
 0x652   :  { %1133 = dma.vmem_to_hbm [thread:$0]  %s1128_s9, 512, %s2192_s20, [#allocation4], %s1795_s17, %s1795_s17, %s1796_s28  }
 0x653   :  { %1779 = dma.done.wait [#allocation4], 512  }
 0x654   :  { %1780 = vsyncadd [#allocation4], 4294966784 }
 0x655   :  { %1137 = vsyncpa [#allocation3], 1 }
 0x656   :  { %1138 = vsyncpa [#allocation6], 1 }
 0x657   :  { %1139 = vsyncpa [#allocation9], 1 }
 0x658   :  { %1140 = vsyncpa [#allocation12], 1 }
 0x659   :  { %1141 = vsyncpa [#allocation15], 1 }
 0x65a   :  { %1142 = vsyncpa [#allocation4], 1 }

// kernel: tpu_custom_call.1
= control target key start
LH: loop header
LB: loop body
LE: loop exit
PB: predicated region body
PF: predicated region fallthrough
CT: control target
= control target key end

     0   :  { %s2166_s0 = inlined_call_operand.hbm [shape: bf16[16,128], index: 0, kind: input, shape index: {}]   ;;  %s2167_s1 = inlined_call_operand.hbm [shape: bf16[128,128], index: 1, kind: input, shape index: {}]   ;;  %s2168_s2 = inlined_call_operand.vmem [shape: f32[1,128], index: 2, kind: input, shape index: {}]   ;;  %s2169_s3 = inlined_call_operand.hbm [shape: bf16[128,128], index: 3, kind: input, shape index: {}]   ;;  %s2170_s4 = inlined_call_operand.vmem [shape: f32[1,128], index: 4, kind: input, shape index: {}]   ;;  %s2171_s5 = inlined_call_operand.hbm [shape: bf16[128,128], index: 5, kind: input, shape index: {}]   ;;  %s2172_s6 = inlined_call_operand.vmem [shape: f32[1,128], index: 6, kind: input, shape index: {}]   ;;  %s2173_s7 = inlined_call_operand.hbm [shape: bf16[128,128], index: 7, kind: input, shape index: {}]   ;;  %s2174_s8 = inlined_call_operand.vmem [shape: f32[1,128], index: 8, kind: input, shape index: {}]   ;;  %s2175_s9 = inlined_call_operand.hbm [shape: bf16[128,128], index: 9, kind: input, shape index: {}]   ;;  %s2176_s10 = inlined_call_operand.vmem [shape: f32[1,128], index: 10, kind: input, shape index: {}]   ;;  %s2177_s11 = inlined_call_operand.hbm [shape: bf16[128,128], index: 11, kind: input, shape index: {}]   ;;  %s2178_s12 = inlined_call_operand.vmem [shape: f32[1,128], index: 12, kind: input, shape index: {}]   ;;  %s2179_s13 = inlined_call_operand.hbm [shape: bf16[128,128], index: 13, kind: input, shape index: {}]   ;;  %s2180_s14 = inlined_call_operand.vmem [shape: f32[1,128], index: 14, kind: input, shape index: {}]   ;;  %s2181_s15 = inlined_call_operand.hbm [shape: bf16[128,128], index: 15, kind: input, shape index: {}]   ;;  %s2182_s16 = inlined_call_operand.vmem [shape: f32[1,128], index: 16, kind: input, shape index: {}]   ;;  %s2183_s17 = inlined_call_operand.hbm [shape: f32[16,256], index: 17, kind: output, shape index: {}]  }
   0x1   :  { %2187 = sst [smem:[#allocation24_spill]] %s2166_s0 }
   0x2   :  { %2188 = sst [smem:[#allocation25_spill]] %s2167_s1 }
   0x3   :  { %2189 = sst [smem:[#allocation26_spill]] %s2183_s17 }
   0x4   :  { %22 = vsyncpa [#allocation3], 0 }
   0x5   :  { %23 = vsyncpa [#allocation6], 0 }
   0x6   :  { %24 = vsyncpa [#allocation9], 0 }
   0x7   :  { %25 = vsyncpa [#allocation12], 0 }
   0x8   :  { %26 = vsyncpa [#allocation15], 0 }
   0x9   :  { %27 = vsyncpa [#allocation4], 0  ;;  %s1781_s24 = smov [#allocation5]   ;;  %s1782_s26 = smov [#allocation8]  }
   0xa   :  { %s45_s25 = sshll.u32 %s1781_s24, 4  ;;  %s73_s27 = sshll.u32 %s1782_s26, 4  ;;  %s46_s25 = int_to_ptr.vmem [resolvable:$true] %s45_s25  ;;  %s1887_s27 = int_to_ptr.vmem [resolvable:$true] %s73_s27 }
   0xb   :  { %s2190_s0 = sld [smem:[#allocation25_spill]] }
  0x11   :  { %s1549_s30 = scalar_lea.hbm %s2190_s0, 1024 }
  0x12   :  { %p1550_p0 = scmp.ne.s32.totalorder %s2190_s0, %s1549_s30  ;;  %p1553_p1 = scmp.lt.u32.totalorder %s1549_s30, %s2190_s0 }
  0x14   :  { %p1555_p2 = pnand %p1553_p1, %p1550_p0 }
  0x16   :  { %1558 = shalt.err (!%p1555_p2)
}
  0x17   :  { %s1559_s21 = scalar_lea.vmem %s46_s25, 1024  ;;  %p1564_p4 = scmp.lt.s32.totalorder %s46_s25, %s46_s25 }
  0x18   :  { %p1560_p3 = scmp.ne.s32.totalorder %s46_s25, %s1559_s21  ;;  %p1565_p5 = scmp.lt.s32.totalorder %s1559_s21, %s1559_s21 }
  0x1a   :  { %p1566_p6 = por %p1565_p5, %p1564_p4 }
  0x1c   :  { %p1567_p7 = pnand %p1566_p6, %p1560_p3 }
  0x1e   :  { %1570 = shalt.err (!%p1567_p7)
}
  0x1f   :  { %s1783_s22 = smov 64   ;;  %s1784_s23 = smov 4  }
  0x20   :  { %51 = dma.hbm_to_vmem [thread:$0]  %s2190_s0, 1024, %s46_s25, [#allocation6], %s1783_s22, %s1783_s22, %s1784_s23  }
  0x21   :  { %s1571_s30 = scalar_lea.hbm %s2171_s5, 1024 }
  0x22   :  { %p1572_p8 = scmp.ne.s32.totalorder %s2171_s5, %s1571_s30  ;;  %p1575_p9 = scmp.lt.u32.totalorder %s1571_s30, %s2171_s5 }
  0x24   :  { %p1577_p10 = pnand %p1575_p9, %p1572_p8 }
  0x26   :  { %1580 = shalt.err (!%p1577_p10)
}
  0x27   :  { %s1581_s21 = scalar_lea.vmem %s1887_s27, 1024  ;;  %p1586_p12 = scmp.lt.s32.totalorder %s1887_s27, %s1887_s27 }
  0x28   :  { %p1582_p11 = scmp.ne.s32.totalorder %s1887_s27, %s1581_s21  ;;  %p1587_p13 = scmp.lt.s32.totalorder %s1581_s21, %s1581_s21 }
  0x2a   :  { %p1588_p0 = por %p1587_p13, %p1586_p12 }
  0x2c   :  { %p1589_p1 = pnand %p1588_p0, %p1582_p11 }
  0x2e   :  { %1592 = shalt.err (!%p1589_p1)
}
  0x2f   :  { %79 = dma.hbm_to_vmem [thread:$0]  %s2171_s5, 1024, %s1887_s27, [#allocation9], %s1783_s22, %s1783_s22, %s1784_s23  }
  0x30   :  { %s1785_s24 = smov [#allocation11]   ;;  %s1786_s28 = smov [#allocation14]  }
  0x31   :  { %s101_s26 = sshll.u32 %s1785_s24, 4  ;;  %s129_s29 = sshll.u32 %s1786_s28, 4  ;;  %s102_s26 = int_to_ptr.vmem [resolvable:$true] %s101_s26  ;;  %s1924_s29 = int_to_ptr.vmem [resolvable:$true] %s129_s29 }
  0x32   :  { %s1593_s19 = scalar_lea.hbm %s2175_s9, 1024 }
  0x33   :  { %p1594_p2 = scmp.ne.s32.totalorder %s2175_s9, %s1593_s19  ;;  %p1597_p3 = scmp.lt.u32.totalorder %s1593_s19, %s2175_s9 }
  0x35   :  { %p1599_p4 = pnand %p1597_p3, %p1594_p2 }
  0x37   :  { %1602 = shalt.err (!%p1599_p4)
}
  0x38   :  { %s1603_s5 = scalar_lea.vmem %s102_s26, 1024  ;;  %p1608_p6 = scmp.lt.s32.totalorder %s102_s26, %s102_s26 }
  0x39   :  { %p1604_p5 = scmp.ne.s32.totalorder %s102_s26, %s1603_s5  ;;  %p1609_p7 = scmp.lt.s32.totalorder %s1603_s5, %s1603_s5 }
  0x3b   :  { %p1610_p8 = por %p1609_p7, %p1608_p6 }
  0x3d   :  { %p1611_p9 = pnand %p1610_p8, %p1604_p5 }
  0x3f   :  { %1614 = shalt.err (!%p1611_p9)
}
  0x40   :  { %107 = dma.hbm_to_vmem [thread:$0]  %s2175_s9, 1024, %s102_s26, [#allocation12], %s1783_s22, %s1783_s22, %s1784_s23  }
  0x41   :  { %s1615_s17 = scalar_lea.hbm %s2179_s13, 1024 }
  0x42   :  { %p1616_p10 = scmp.ne.s32.totalorder %s2179_s13, %s1615_s17  ;;  %p1619_p11 = scmp.lt.u32.totalorder %s1615_s17, %s2179_s13 }
  0x44   :  { %p1621_p12 = pnand %p1619_p11, %p1616_p10 }
  0x46   :  { %1624 = shalt.err (!%p1621_p12)
}
  0x47   :  { %s1625_s1 = scalar_lea.vmem %s1924_s29, 1024  ;;  %p1630_p0 = scmp.lt.s32.totalorder %s1924_s29, %s1924_s29 }
  0x48   :  { %p1626_p13 = scmp.ne.s32.totalorder %s1924_s29, %s1625_s1  ;;  %p1631_p1 = scmp.lt.s32.totalorder %s1625_s1, %s1625_s1 }
  0x4a   :  { %p1632_p2 = por %p1631_p1, %p1630_p0 }
  0x4c   :  { %p1633_p3 = pnand %p1632_p2, %p1626_p13 }
  0x4e   :  { %1636 = shalt.err (!%p1633_p3)
}
  0x4f   :  { %135 = dma.hbm_to_vmem [thread:$0]  %s2179_s13, 1024, %s1924_s29, [#allocation15], %s1783_s22, %s1783_s22, %s1784_s23  }
  0x50   :  { %s1787_s20 = smov [#allocation2]   ;;  %s1788_s5 = smov [#allocation7]  }
  0x51   :  { %s33_s21 = sshll.u32 %s1787_s20, 4  ;;  %s59_s27 = sshll.u32 %s1788_s5, 4  ;;  %s34_s21 = int_to_ptr.vmem [resolvable:$true] %s33_s21  ;;  %s1961_s27 = int_to_ptr.vmem [resolvable:$true] %s59_s27 }
  0x52   :  { %s2191_s24 = sld [smem:[#allocation24_spill]] }
  0x58   :  { %s1637_s17 = scalar_lea.hbm %s2191_s24, 128 }
  0x59   :  { %p1638_p4 = scmp.ne.s32.totalorder %s2191_s24, %s1637_s17  ;;  %p1641_p5 = scmp.lt.u32.totalorder %s1637_s17, %s2191_s24 }
  0x5b   :  { %p1643_p6 = pnand %p1641_p5, %p1638_p4 }
  0x5d   :  { %1646 = shalt.err (!%p1643_p6)
}
  0x5e   :  { %s1647_s13 = scalar_lea.vmem %s34_s21, 128  ;;  %p1652_p8 = scmp.lt.s32.totalorder %s34_s21, %s34_s21 }
  0x5f   :  { %p1648_p7 = scmp.ne.s32.totalorder %s34_s21, %s1647_s13  ;;  %p1653_p9 = scmp.lt.s32.totalorder %s1647_s13, %s1647_s13 }
  0x61   :  { %p1654_p10 = por %p1653_p9, %p1652_p8 }
  0x63   :  { %p1655_p11 = pnand %p1654_p10, %p1648_p7 }
  0x65   :  { %1658 = shalt.err (!%p1655_p11)
}
  0x66   :  { %39 = dma.hbm_to_vmem [thread:$0]  %s2191_s24, 128, %s34_s21, [#allocation3], %s1783_s22, %s1783_s22, %s1784_s23  }
  0x67   :  { %s1659_s20 = scalar_lea.hbm %s2169_s3, 1024 }
  0x68   :  { %p1660_p12 = scmp.ne.s32.totalorder %s2169_s3, %s1659_s20  ;;  %p1663_p13 = scmp.lt.u32.totalorder %s1659_s20, %s2169_s3 }
  0x6a   :  { %p1665_p0 = pnand %p1663_p13, %p1660_p12 }
  0x6c   :  { %1668 = shalt.err (!%p1665_p0)
}
  0x6d   :  { %s1669_s28 = scalar_lea.vmem %s1961_s27, 1024  ;;  %p1674_p2 = scmp.lt.s32.totalorder %s1961_s27, %s1961_s27 }
  0x6e   :  { %p1670_p1 = scmp.ne.s32.totalorder %s1961_s27, %s1669_s28  ;;  %p1675_p3 = scmp.lt.s32.totalorder %s1669_s28, %s1669_s28 }
  0x70   :  { %p1676_p4 = por %p1675_p3, %p1674_p2 }
  0x72   :  { %p1677_p5 = pnand %p1676_p4, %p1670_p1 }
  0x74   :  { %1680 = shalt.err (!%p1677_p5)
}
  0x75   :  { %65 = dma.hbm_to_vmem [thread:$0]  %s2169_s3, 1024, %s1961_s27, [#allocation6], %s1783_s22, %s1783_s22, %s1784_s23  }
  0x76   :  { %s1789_s30 = smov [#allocation10]   ;;  %s1790_s19 = smov [#allocation13]  }
  0x77   :  { %s87_s18 = sshll.u32 %s1789_s30, 4  ;;  %s115_s13 = sshll.u32 %s1790_s19, 4  ;;  %s88_s18 = int_to_ptr.vmem [resolvable:$true] %s87_s18  ;;  %s1998_s13 = int_to_ptr.vmem [resolvable:$true] %s115_s13 }
  0x78   :  { %s1681_s9 = scalar_lea.hbm %s2173_s7, 1024 }
  0x79   :  { %p1682_p6 = scmp.ne.s32.totalorder %s2173_s7, %s1681_s9  ;;  %p1685_p7 = scmp.lt.u32.totalorder %s1681_s9, %s2173_s7 }
  0x7b   :  { %p1687_p8 = pnand %p1685_p7, %p1682_p6 }
  0x7d   :  { %1690 = shalt.err (!%p1687_p8)
}
  0x7e   :  { %s1691_s3 = scalar_lea.vmem %s88_s18, 1024  ;;  %p1696_p10 = scmp.lt.s32.totalorder %s88_s18, %s88_s18 }
  0x7f   :  { %p1692_p9 = scmp.ne.s32.totalorder %s88_s18, %s1691_s3  ;;  %p1697_p11 = scmp.lt.s32.totalorder %s1691_s3, %s1691_s3 }
  0x81   :  { %p1698_p12 = por %p1697_p11, %p1696_p10 }
  0x83   :  { %p1699_p13 = pnand %p1698_p12, %p1692_p9 }
  0x85   :  { %1702 = shalt.err (!%p1699_p13)
}
  0x86   :  { %93 = dma.hbm_to_vmem [thread:$0]  %s2173_s7, 1024, %s88_s18, [#allocation9], %s1783_s22, %s1783_s22, %s1784_s23  }
  0x87   :  { %s1703_s21 = scalar_lea.hbm %s2177_s11, 1024 }
  0x88   :  { %p1704_p0 = scmp.ne.s32.totalorder %s2177_s11, %s1703_s21  ;;  %p1707_p1 = scmp.lt.u32.totalorder %s1703_s21, %s2177_s11 }
  0x8a   :  { %p1709_p2 = pnand %p1707_p1, %p1704_p0 }
  0x8c   :  { %1712 = shalt.err (!%p1709_p2)
}
  0x8d   :  { %s1713_s1 = scalar_lea.vmem %s1998_s13, 1024  ;;  %p1718_p4 = scmp.lt.s32.totalorder %s1998_s13, %s1998_s13 }
  0x8e   :  { %p1714_p3 = scmp.ne.s32.totalorder %s1998_s13, %s1713_s1  ;;  %p1719_p5 = scmp.lt.s32.totalorder %s1713_s1, %s1713_s1 }
  0x90   :  { %p1720_p6 = por %p1719_p5, %p1718_p4 }
  0x92   :  { %p1721_p7 = pnand %p1720_p6, %p1714_p3 }
  0x94   :  { %1724 = shalt.err (!%p1721_p7)
}
  0x95   :  { %121 = dma.hbm_to_vmem [thread:$0]  %s2177_s11, 1024, %s1998_s13, [#allocation12], %s1783_s22, %s1783_s22, %s1784_s23  }
  0x96   :  { %s1791_s9 = smov [#allocation16]   ;;  %s1725_s25 = scalar_lea.hbm %s2181_s15, 1024 }
  0x97   :  { %s143_s26 = sshll.u32 %s1791_s9, 4  ;;  %p1726_p8 = scmp.ne.s32.totalorder %s2181_s15, %s1725_s25  ;;  %s144_s26 = int_to_ptr.vmem [resolvable:$true] %s143_s26 }
  0x98   :  { %p1729_p9 = scmp.lt.u32.totalorder %s1725_s25, %s2181_s15 }
  0x9a   :  { %p1731_p10 = pnand %p1729_p9, %p1726_p8 }
  0x9c   :  { %1734 = shalt.err (!%p1731_p10)
}
  0x9d   :  { %s1735_s28 = scalar_lea.vmem %s144_s26, 1024  ;;  %p1740_p12 = scmp.lt.s32.totalorder %s144_s26, %s144_s26 }
  0x9e   :  { %p1736_p11 = scmp.ne.s32.totalorder %s144_s26, %s1735_s28  ;;  %p1741_p13 = scmp.lt.s32.totalorder %s1735_s28, %s1735_s28 }
  0xa0   :  { %p1742_p0 = por %p1741_p13, %p1740_p12 }
  0xa2   :  { %p1743_p1 = pnand %p1742_p0, %p1736_p11 }
  0xa4   :  { %1746 = shalt.err (!%p1743_p1)
}
  0xa5   :  { %149 = dma.hbm_to_vmem [thread:$0]  %s2181_s15, 1024, %s144_s26, [#allocation15], %s1783_s22, %s1783_s22, %s1784_s23  }
  0xa6   :  { %1769 = dma.done.wait [#allocation3], 128  }
  0xa7   :  { %1770 = vsyncadd [#allocation3], 4294967168 }
  0xa8   :  { %1771 = dma.done.wait [#allocation6], 2048  }
  0xa9   :  { %1772 = vsyncadd [#allocation6], 4294965248 }
  0xaa   :  { %1773 = dma.done.wait [#allocation9], 2048  }
  0xab   :  { %1774 = vsyncadd [#allocation9], 4294965248 }
  0xac   :  { %1775 = dma.done.wait [#allocation12], 2048  }
  0xad   :  { %1776 = vsyncadd [#allocation12], 4294965248 }
  0xae   :  { %1777 = dma.done.wait [#allocation15], 2048  }
  0xaf   :  { %1778 = vsyncadd [#allocation15], 4294965248  ;;  %v1792_v0 = vmov 0.0   ;;  %vm1793_vm0 = vmmov 0   ;;  %v1468_v1 = vld [vmem:[#allocation5] sm:$0xff]   ;;  %v1469_v2 = vld [vmem:[#allocation5 + $0x8] sm:$0xff]  }
  0xb0   :  { %1292 = vmatprep.subr.bf16.mxu0 %v1792_v0  ;;  %1308 = vmatprep.mubr.msk.bf16.mxu0 %vm1793_vm0, %v1792_v0  ;;  %v1470_v3 = vld [vmem:[#allocation5 + $0x10] sm:$0xff]   ;;  %v1471_v4 = vld [vmem:[#allocation5 + $0x18] sm:$0xff]   ;;  %v1472_v5 = vld [vmem:[#allocation5 + $0x20] sm:$0xff]   ;;  %s1794_s18 = smov [#allocation17]  }
  0xb1   :  { %1312 = vmatprep.subr.bf16.mxu1 %v1792_v0  ;;  %1328 = vmatprep.mubr.msk.bf16.mxu1 %vm1793_vm0, %v1792_v0  ;;  %v1473_v6 = vld [vmem:[#allocation5 + $0x28] sm:$0xff]   ;;  %v1474_v7 = vld [vmem:[#allocation5 + $0x30] sm:$0xff]   ;;  %v1475_v8 = vld [vmem:[#allocation5 + $0x38] sm:$0xff]   ;;  %s1127_s9 = sshll.u32 %s1794_s18, 4  ;;  %s1128_s9 = int_to_ptr.vmem [resolvable:$true] %s1127_s9 }
  0xb2   :  { %1293 = vmatpush3.bf16.msra.mxu0 %v1468_v1  ;;  %v1476_v9 = vld [vmem:[#allocation2] sm:$0xff]   ;;  %v1477_v10 = vld [vmem:[#allocation7] sm:$0xff]   ;;  %v1478_v11 = vld [vmem:[#allocation7 + $0x8] sm:$0xff]   ;;  %p1752_p3 = scmp.lt.s32.totalorder %s1128_s9, %s1128_s9 }
  0xb3   :  { %1294 = vmatprep.subr.bf16.mxu0 %v1792_v0  ;;  %1313 = vmatpush3.bf16.msra.mxu1 %v1477_v10  ;;  %v1479_v12 = vld [vmem:[#allocation7 + $0x10] sm:$0xff]   ;;  %v1480_v13 = vld [vmem:[#allocation7 + $0x18] sm:$0xff]   ;;  %v1481_v14 = vld [vmem:[#allocation7 + $0x20] sm:$0xff]  }
  0xb4   :  { %1314 = vmatprep.subr.bf16.mxu1 %v1792_v0  ;;  %v1482_v15 = vld [vmem:[#allocation7 + $0x28] sm:$0xff]   ;;  %v1483_v16 = vld [vmem:[#allocation7 + $0x30] sm:$0xff]   ;;  %v1484_v17 = vld [vmem:[#allocation7 + $0x38] sm:$0xff]  }
  0xb5   :  { %v1143_v18 = vld [vmem:[%s2168_s2] ss:$0 sm:$0xff]  ;;  %v1485_v36 = vld [vmem:[#allocation8] sm:$0xff]   ;;  %v1486_v37 = vld [vmem:[#allocation8 + $0x8] sm:$0xff]  }
  0xb6   :  { %1295 = vmatpush3.bf16.msra.mxu0 %v1469_v2  ;;  %v1487_v38 = vld [vmem:[#allocation8 + $0x10] sm:$0xff]   ;;  %v1488_v39 = vld [vmem:[#allocation8 + $0x18] sm:$0xff]   ;;  %v1489_v40 = vld [vmem:[#allocation8 + $0x20] sm:$0xff]  }
  0xb7   :  { %1296 = vmatprep.subr.bf16.mxu0 %v1792_v0  ;;  %1315 = vmatpush3.bf16.msra.mxu1 %v1478_v11  ;;  %v1490_v41 = vld [vmem:[#allocation8 + $0x28] sm:$0xff]   ;;  %v1491_v42 = vld [vmem:[#allocation8 + $0x30] sm:$0xff]   ;;  %v1492_v43 = vld [vmem:[#allocation8 + $0x38] sm:$0xff]  }
  0xb8   :  { %1316 = vmatprep.subr.bf16.mxu1 %v1792_v0  ;;  %v1493_v44 = vld [vmem:[#allocation10] sm:$0xff]   ;;  %v1494_v45 = vld [vmem:[#allocation10 + $0x8] sm:$0xff]   ;;  %v1495_v46 = vld [vmem:[#allocation10 + $0x10] sm:$0xff]  }
  0xb9   :  { %v1496_v47 = vld [vmem:[#allocation10 + $0x18] sm:$0xff]   ;;  %v1497_v48 = vld [vmem:[#allocation10 + $0x20] sm:$0xff]   ;;  %v1498_v49 = vld [vmem:[#allocation10 + $0x28] sm:$0xff]  }
  0xba   :  { %1297 = vmatpush3.bf16.msra.mxu0 %v1470_v3  ;;  %v1499_v50 = vld [vmem:[#allocation10 + $0x30] sm:$0xff]   ;;  %v1155_v51 = vld [vmem:[%s2170_s4] ss:$0 sm:$0xff]  ;;  %v1513_v11 = vld [vmem:[#allocation11 + $0x20] sm:$0xff]  }
  0xbb   :  { %1298 = vmatprep.subr.bf16.mxu0 %v1792_v0  ;;  %1317 = vmatpush3.bf16.msra.mxu1 %v1479_v12  ;;  %v1512_v10 = vld [vmem:[#allocation11 + $0x18] sm:$0xff]   ;;  %v1514_v12 = vld [vmem:[#allocation11 + $0x28] sm:$0xff]  }
  0xbc   :  { %1318 = vmatprep.subr.bf16.mxu1 %v1792_v0 }
  0xbe   :  { %1299 = vmatpush3.bf16.msra.mxu0 %v1471_v4 }
  0xbf   :  { %1300 = vmatprep.subr.bf16.mxu0 %v1792_v0  ;;  %1319 = vmatpush3.bf16.msra.mxu1 %v1480_v13  ;;  %v1515_v13 = vld [vmem:[#allocation11 + $0x30] sm:$0xff]  }
  0xc0   :  { %1320 = vmatprep.subr.bf16.mxu1 %v1792_v0 }
  0xc2   :  { %1301 = vmatpush3.bf16.msra.mxu0 %v1472_v5 }
  0xc3   :  { %1302 = vmatprep.subr.bf16.mxu0 %v1792_v0  ;;  %1321 = vmatpush3.bf16.msra.mxu1 %v1481_v14  ;;  %v1166_v14 = vld [vmem:[%s2172_s6] ss:$0 sm:$0xff] }
  0xc4   :  { %1322 = vmatprep.subr.bf16.mxu1 %v1792_v0 }
  0xc6   :  { %1303 = vmatpush3.bf16.msra.mxu0 %v1473_v6  ;;  %v1500_v6 = vld [vmem:[#allocation10 + $0x38] sm:$0xff]  }
  0xc7   :  { %1304 = vmatprep.subr.bf16.mxu0 %v1792_v0  ;;  %1323 = vmatpush3.bf16.msra.mxu1 %v1482_v15 }
  0xc8   :  { %1324 = vmatprep.subr.bf16.mxu1 %v1792_v0 }
  0xca   :  { %1305 = vmatpush3.bf16.msra.mxu0 %v1474_v7  ;;  %v1509_v7 = vld [vmem:[#allocation11] sm:$0xff]  }
  0xcb   :  { %1306 = vmatprep.subr.bf16.mxu0 %v1792_v0  ;;  %1325 = vmatpush3.bf16.msra.mxu1 %v1483_v16 }
  0xcc   :  { %1326 = vmatprep.subr.bf16.mxu1 %v1792_v0 }
  0xce   :  { %1307 = vmatpush3.bf16.msra.mxu0 %v1475_v8  ;;  %v1510_v8 = vld [vmem:[#allocation11 + $0x8] sm:$0xff]  }
  0xcf   :  { %1332 = vmatprep.subr.bf16.mxu0 %v1792_v0  ;;  %1327 = vmatpush3.bf16.msra.mxu1 %v1484_v17 }
  0xd0   :  { %1352 = vmatprep.subr.bf16.mxu1 %v1792_v0 }
  0xd1   :  { %1309 = vmatmul.mubr.bf16.vlgmr.msra.gmra.mrb[0].mxu0 %v1476_v9  ;;  %v1511_v9 = vld [vmem:[#allocation11 + $0x10] sm:$0xff]  }
  0xd2   :  { %1348 = vmatprep.mubr.msk.bf16.mxu0 %vm1793_vm0, %v1792_v0  ;;  %1333 = vmatpush3.bf16.msra.mxu0 %v1485_v36 }
  0xd3   :  { %1334 = vmatprep.subr.bf16.mxu0 %v1792_v0 }
  0xd6   :  { %1335 = vmatpush3.bf16.msra.mxu0 %v1486_v37 }
  0xd7   :  { %1336 = vmatprep.subr.bf16.mxu0 %v1792_v0 }
  0xda   :  { %1337 = vmatpush3.bf16.msra.mxu0 %v1487_v38  ;;  %v1517_v38 = vld [vmem:[#allocation14] sm:$0xff]  }
  0xdb   :  { %1338 = vmatprep.subr.bf16.mxu0 %v1792_v0 }
  0xde   :  { %1339 = vmatpush3.bf16.msra.mxu0 %v1488_v39 }
  0xdf   :  { %1340 = vmatprep.subr.bf16.mxu0 %v1792_v0 }
  0xe2   :  { %1341 = vmatpush3.bf16.msra.mxu0 %v1489_v40  ;;  %v1518_v40 = vld [vmem:[#allocation14 + $0x8] sm:$0xff]  }
  0xe3   :  { %1342 = vmatprep.subr.bf16.mxu0 %v1792_v0 }
  0xe6   :  { %1343 = vmatpush3.bf16.msra.mxu0 %v1490_v41  ;;  %v1519_v41 = vld [vmem:[#allocation14 + $0x10] sm:$0xff]  }
  0xe7   :  { %1344 = vmatprep.subr.bf16.mxu0 %v1792_v0 }
  0xea   :  { %1345 = vmatpush3.bf16.msra.mxu0 %v1491_v42  ;;  %v1520_v42 = vld [vmem:[#allocation14 + $0x18] sm:$0xff]  }
  0xeb   :  { %1346 = vmatprep.subr.bf16.mxu0 %v1792_v0 }
  0xee   :  { %1347 = vmatpush3.bf16.msra.mxu0 %v1492_v43  ;;  %v1521_v43 = vld [vmem:[#allocation14 + $0x20] sm:$0xff]  }
  0xef   :  { %1372 = vmatprep.subr.bf16.mxu0 %v1792_v0 }
 0x1a4   :  { %v293_v19 = vpop.f32.mrb[0].mxu0 }
 0x1a5   :  { %v294_v20 = vadd.f32 %v1143_v18, %v293_v19  ;;  %v1310_v21 = vpop.f32.mrb[1].mxu0 }
 0x1a6   :  { %v296_v22 = vpop.f32.mrb[2].mxu0  ;;  %v1501_v21 = vld [vmem:[#allocation13] sm:$0xff]  }
 0x1a7   :  { %v1153_v23 = vmul.f32 -1.442695, %v294_v20  ;;  %v297_v24 = vadd.f32 %v1143_v18, %v296_v22  ;;  %v1311_v25 = vpop.f32.mrb[3].mxu0 }
 0x1a8   :  { %v1504_v25 = vld [vmem:[#allocation13 + $0x18] sm:$0xff]  }
 0x1a9   :  { %1533 = vpow2.f32 %v1153_v23  ;;  %v1154_v26 = vmul.f32 -1.442695, %v297_v24  ;;  %v1502_v23 = vld [vmem:[#allocation13 + $0x8] sm:$0xff]  }
 0x1ab   :  { %1535 = vpow2.f32 %v1154_v26  ;;  %v1505_v26 = vld [vmem:[#allocation13 + $0x20] sm:$0xff]  }
 0x1b3   :  { %v1534_v27 = vpop.eup %1533 }
 0x1b4   :  { %v306_v28 = vadd.f32 1.0, %v1534_v27  ;;  %v1506_v27 = vld [vmem:[#allocation13 + $0x28] sm:$0xff]  }
 0x1b5   :  { %v1536_v29 = vpop.eup %1535 }
 0x1b6   :  { %1537 = vrcp.f32 %v306_v28  ;;  %v307_v30 = vadd.f32 1.0, %v1536_v29  ;;  %v1507_v28 = vld [vmem:[#allocation13 + $0x30] sm:$0xff]   ;;  %v1508_v29 = vld [vmem:[#allocation13 + $0x38] sm:$0xff]  }
 0x1b8   :  { %1539 = vrcp.f32 %v307_v30  ;;  %v1516_v30 = vld [vmem:[#allocation11 + $0x38] sm:$0xff]  }
 0x1c0   :  { %v1538_v31 = vpop.eup %1537 }
 0x1c1   :  { %v312_v33 = vmul.f32 %v1538_v31, %v294_v20  ;;  %v1175_v31 = vld [vmem:[%s2174_s8] ss:$0 sm:$0xff] }
 0x1c2   :  { %v1540_v32 = vpop.eup %1539 }
 0x1c3   :  { %v313_v34 = vmul.f32 %v1540_v32, %v297_v24  ;;  %v1503_v24 = vld [vmem:[#allocation13 + $0x10] sm:$0xff]  }
 0x1c5   :  { %v314_v35 = vpack.c.bf16 %v313_v34, %v312_v33 }
 0x1c7   :  { %1329 = vmatmul.mubr.bf16.vlgmr.msra.gmra.mrb[0].mxu1 %v314_v35 }
 0x1c8   :  { %1368 = vmatprep.mubr.msk.bf16.mxu1 %vm1793_vm0, %v1792_v0  ;;  %1353 = vmatpush3.bf16.msra.mxu1 %v1493_v44  ;;  %v1522_v44 = vld [vmem:[#allocation14 + $0x28] sm:$0xff]  }
 0x1c9   :  { %1354 = vmatprep.subr.bf16.mxu1 %v1792_v0 }
 0x1cc   :  { %1355 = vmatpush3.bf16.msra.mxu1 %v1494_v45  ;;  %v1523_v45 = vld [vmem:[#allocation14 + $0x30] sm:$0xff]  }
 0x1cd   :  { %1356 = vmatprep.subr.bf16.mxu1 %v1792_v0 }
 0x1d0   :  { %1357 = vmatpush3.bf16.msra.mxu1 %v1495_v46  ;;  %v1193_v46 = vld [vmem:[%s2178_s12] ss:$0 sm:$0xff] }
 0x1d1   :  { %1358 = vmatprep.subr.bf16.mxu1 %v1792_v0 }
 0x1d4   :  { %1359 = vmatpush3.bf16.msra.mxu1 %v1496_v47 }
 0x1d5   :  { %1360 = vmatprep.subr.bf16.mxu1 %v1792_v0 }
 0x1d8   :  { %1361 = vmatpush3.bf16.msra.mxu1 %v1497_v48  ;;  %v1524_v48 = vld [vmem:[#allocation14 + $0x38] sm:$0xff]  }
 0x1d9   :  { %1362 = vmatprep.subr.bf16.mxu1 %v1792_v0 }
 0x1dc   :  { %1363 = vmatpush3.bf16.msra.mxu1 %v1498_v49 }
 0x1dd   :  { %1364 = vmatprep.subr.bf16.mxu1 %v1792_v0 }
 0x1e0   :  { %1365 = vmatpush3.bf16.msra.mxu1 %v1499_v50 }
 0x1e1   :  { %1366 = vmatprep.subr.bf16.mxu1 %v1792_v0 }
 0x1e4   :  { %1367 = vmatpush3.bf16.msra.mxu1 %v1500_v6 }
 0x1e5   :  { %1392 = vmatprep.subr.bf16.mxu1 %v1792_v0 }
 0x29a   :  { %v420_v52 = vpop.f32.mrb[0].mxu1 }
 0x29b   :  { %v421_v53 = vadd.f32 %v1155_v51, %v420_v52  ;;  %v1330_v54 = vpop.f32.mrb[1].mxu1 }
 0x29c   :  { %v423_v55 = vpop.f32.mrb[2].mxu1 }
 0x29d   :  { %v1164_v56 = vmul.f32 -1.442695, %v421_v53  ;;  %v424_v57 = vadd.f32 %v1155_v51, %v423_v55  ;;  %v1331_v58 = vpop.f32.mrb[3].mxu1  ;;  %v1525_v55 = vld [vmem:[#allocation16] sm:$0xff]  }
 0x29e   :  { %v1528_v58 = vld [vmem:[#allocation16 + $0x18] sm:$0xff]  }
 0x29f   :  { %1541 = vpow2.f32 %v1164_v56  ;;  %v1165_v59 = vmul.f32 -1.442695, %v424_v57  ;;  %v1526_v56 = vld [vmem:[#allocation16 + $0x8] sm:$0xff]  }
 0x2a1   :  { %1543 = vpow2.f32 %v1165_v59  ;;  %v1529_v59 = vld [vmem:[#allocation16 + $0x20] sm:$0xff]  }
 0x2a9   :  { %v1542_v60 = vpop.eup %1541 }
 0x2aa   :  { %v433_v61 = vadd.f32 1.0, %v1542_v60  ;;  %v1530_v60 = vld [vmem:[#allocation16 + $0x28] sm:$0xff]  }
 0x2ab   :  { %v1544_v62 = vpop.eup %1543 }
 0x2ac   :  { %1545 = vrcp.f32 %v433_v61  ;;  %v434_v63 = vadd.f32 1.0, %v1544_v62  ;;  %v1531_v61 = vld [vmem:[#allocation16 + $0x30] sm:$0xff]   ;;  %v1532_v62 = vld [vmem:[#allocation16 + $0x38] sm:$0xff]  }
 0x2ae   :  { %1547 = vrcp.f32 %v434_v63  ;;  %v1184_v63 = vld [vmem:[%s2176_s10] ss:$0 sm:$0xff] }
 0x2b6   :  { %v1546_v1 = vpop.eup %1545 }
 0x2b7   :  { %v439_v3 = vmul.f32 %v1546_v1, %v421_v53 }
 0x2b8   :  { %v1548_v2 = vpop.eup %1547 }
 0x2b9   :  { %v440_v4 = vmul.f32 %v1548_v2, %v424_v57  ;;  %v1527_v57 = vld [vmem:[#allocation16 + $0x10] sm:$0xff]  }
 0x2bb   :  { %v441_v5 = vpack.c.bf16 %v440_v4, %v439_v3 }
 0x2bd   :  { %1349 = vmatmul.mubr.bf16.vlgmr.msra.gmra.mrb[4].mxu0 %v441_v5 }
 0x2be   :  { %1388 = vmatprep.mubr.msk.bf16.mxu0 %vm1793_vm0, %v1792_v0  ;;  %1373 = vmatpush3.bf16.msra.mxu0 %v1509_v7  ;;  %v1202_v7 = vld [vmem:[%s2180_s14] ss:$0 sm:$0xff]  ;;  %s1747_s14 = scalar_lea.vmem %s1128_s9, 512 }
 0x2bf   :  { %1374 = vmatprep.subr.bf16.mxu0 %v1792_v0  ;;  %p1748_p2 = scmp.ne.s32.totalorder %s1128_s9, %s1747_s14  ;;  %p1753_p4 = scmp.lt.s32.totalorder %s1747_s14, %s1747_s14 }
 0x2c1   :  { %p1754_p5 = por %p1753_p4, %p1752_p3 }
 0x2c2   :  { %1375 = vmatpush3.bf16.msra.mxu0 %v1510_v8 }
 0x2c3   :  { %1376 = vmatprep.subr.bf16.mxu0 %v1792_v0  ;;  %p1755_p6 = pnand %p1754_p5, %p1748_p2 }
 0x2c6   :  { %1377 = vmatpush3.bf16.msra.mxu0 %v1511_v9 }
 0x2c7   :  { %1378 = vmatprep.subr.bf16.mxu0 %v1792_v0 }
 0x2ca   :  { %1379 = vmatpush3.bf16.msra.mxu0 %v1512_v10 }
 0x2cb   :  { %1380 = vmatprep.subr.bf16.mxu0 %v1792_v0 }
 0x2ce   :  { %1381 = vmatpush3.bf16.msra.mxu0 %v1513_v11 }
 0x2cf   :  { %1382 = vmatprep.subr.bf16.mxu0 %v1792_v0 }
 0x2d2   :  { %1383 = vmatpush3.bf16.msra.mxu0 %v1514_v12 }
 0x2d3   :  { %1384 = vmatprep.subr.bf16.mxu0 %v1792_v0 }
 0x2d6   :  { %1385 = vmatpush3.bf16.msra.mxu0 %v1515_v13 }
 0x2d7   :  { %1386 = vmatprep.subr.bf16.mxu0 %v1792_v0 }
 0x2da   :  { %1387 = vmatpush3.bf16.msra.mxu0 %v1516_v30 }
 0x2db   :  { %1412 = vmatprep.subr.bf16.mxu0 %v1792_v0 }
 0x390   :  { %v547_v15 = vpop.f32.mrb[4].mxu0 }
 0x391   :  { %v1350_v16 = vpop.f32.mrb[5].mxu0  ;;  %v548_v18 = vadd.f32 %v1166_v14, %v547_v15 }
 0x392   :  { %v550_v17 = vpop.f32.mrb[6].mxu0 }
 0x393   :  { %v551_v19 = vadd.f32 %v1166_v14, %v550_v17  ;;  %v1351_v20 = vpop.f32.mrb[7].mxu0  ;;  %v1211_v14 = vld [vmem:[%s2182_s16] ss:$0 sm:$0xff] }
 0x395   :  { %v554_v22 = vpack.c.bf16 %v551_v19, %v548_v18 }
 0x397   :  { %1369 = vmatmul.mubr.bf16.vlgmr.msra.gmra.mrb[4].mxu1 %v554_v22 }
 0x398   :  { %1393 = vmatpush3.bf16.msra.mxu1 %v1501_v21  ;;  %1408 = vmatprep.mubr.msk.bf16.mxu1 %vm1793_vm0, %v1792_v0 }
 0x399   :  { %1394 = vmatprep.subr.bf16.mxu1 %v1792_v0 }
 0x39c   :  { %1395 = vmatpush3.bf16.msra.mxu1 %v1502_v23 }
 0x39d   :  { %1396 = vmatprep.subr.bf16.mxu1 %v1792_v0 }
 0x3a0   :  { %1397 = vmatpush3.bf16.msra.mxu1 %v1503_v24 }
 0x3a1   :  { %1398 = vmatprep.subr.bf16.mxu1 %v1792_v0 }
 0x3a4   :  { %1399 = vmatpush3.bf16.msra.mxu1 %v1504_v25 }
 0x3a5   :  { %1400 = vmatprep.subr.bf16.mxu1 %v1792_v0 }
 0x3a8   :  { %1401 = vmatpush3.bf16.msra.mxu1 %v1505_v26 }
 0x3a9   :  { %1402 = vmatprep.subr.bf16.mxu1 %v1792_v0 }
 0x3ac   :  { %1403 = vmatpush3.bf16.msra.mxu1 %v1506_v27 }
 0x3ad   :  { %1404 = vmatprep.subr.bf16.mxu1 %v1792_v0 }
 0x3b0   :  { %1405 = vmatpush3.bf16.msra.mxu1 %v1507_v28 }
 0x3b1   :  { %1406 = vmatprep.subr.bf16.mxu1 %v1792_v0 }
 0x3b4   :  { %1407 = vmatpush3.bf16.msra.mxu1 %v1508_v29 }
 0x3b5   :  { %1432 = vmatprep.subr.bf16.mxu1 %v1792_v0 }
 0x3b7   :  { %1409 = vmatmul.mubr.bf16.vlgmr.msra.gmra.mrb[8].mxu1 %v441_v5 }
 0x3b8   :  { %1448 = vmatprep.mubr.msk.bf16.mxu1 %vm1793_vm0, %v1792_v0  ;;  %1433 = vmatpush3.bf16.msra.mxu1 %v1525_v55 }
 0x3b9   :  { %1434 = vmatprep.subr.bf16.mxu1 %v1792_v0 }
 0x3bc   :  { %1435 = vmatpush3.bf16.msra.mxu1 %v1526_v56 }
 0x3bd   :  { %1436 = vmatprep.subr.bf16.mxu1 %v1792_v0 }
 0x3c0   :  { %1437 = vmatpush3.bf16.msra.mxu1 %v1527_v57 }
 0x3c1   :  { %1438 = vmatprep.subr.bf16.mxu1 %v1792_v0 }
 0x3c4   :  { %1439 = vmatpush3.bf16.msra.mxu1 %v1528_v58 }
 0x3c5   :  { %1440 = vmatprep.subr.bf16.mxu1 %v1792_v0 }
 0x3c8   :  { %1441 = vmatpush3.bf16.msra.mxu1 %v1529_v59 }
 0x3c9   :  { %1442 = vmatprep.subr.bf16.mxu1 %v1792_v0 }
 0x3cc   :  { %1443 = vmatpush3.bf16.msra.mxu1 %v1530_v60 }
 0x3cd   :  { %1444 = vmatprep.subr.bf16.mxu1 %v1792_v0 }
 0x3d0   :  { %1445 = vmatpush3.bf16.msra.mxu1 %v1531_v61 }
 0x3d1   :  { %1446 = vmatprep.subr.bf16.mxu1 %v1792_v0 }
 0x3d4   :  { %1447 = vmatpush3.bf16.msra.mxu1 %v1532_v62 }
 0x46a   :  { %v660_v32 = vpop.f32.mrb[4].mxu1 }
 0x46b   :  { %v1370_v33 = vpop.f32.mrb[5].mxu1  ;;  %v661_v35 = vadd.f32 %v1175_v31, %v660_v32 }
 0x46c   :  { %v663_v34 = vpop.f32.mrb[6].mxu1 }
 0x46d   :  { %v664_v36 = vadd.f32 %v1175_v31, %v663_v34  ;;  %v1371_v37 = vpop.f32.mrb[7].mxu1 }
 0x46f   :  { %v667_v39 = vpack.c.bf16 %v664_v36, %v661_v35 }
 0x471   :  { %1389 = vmatmul.mubr.bf16.vlgmr.msra.gmra.mrb[8].mxu0 %v667_v39 }
 0x472   :  { %1413 = vmatpush3.bf16.msra.mxu0 %v1517_v38  ;;  %1428 = vmatprep.mubr.msk.bf16.mxu0 %vm1793_vm0, %v1792_v0 }
 0x473   :  { %1414 = vmatprep.subr.bf16.mxu0 %v1792_v0 }
 0x476   :  { %1415 = vmatpush3.bf16.msra.mxu0 %v1518_v40 }
 0x477   :  { %1416 = vmatprep.subr.bf16.mxu0 %v1792_v0 }
 0x47a   :  { %1417 = vmatpush3.bf16.msra.mxu0 %v1519_v41 }
 0x47b   :  { %1418 = vmatprep.subr.bf16.mxu0 %v1792_v0 }
 0x47e   :  { %1419 = vmatpush3.bf16.msra.mxu0 %v1520_v42 }
 0x47f   :  { %1420 = vmatprep.subr.bf16.mxu0 %v1792_v0 }
 0x482   :  { %1421 = vmatpush3.bf16.msra.mxu0 %v1521_v43 }
 0x483   :  { %1422 = vmatprep.subr.bf16.mxu0 %v1792_v0 }
 0x486   :  { %1423 = vmatpush3.bf16.msra.mxu0 %v1522_v44 }
 0x487   :  { %1424 = vmatprep.subr.bf16.mxu0 %v1792_v0 }
 0x48a   :  { %v887_v47 = vpop.f32.mrb[8].mxu1  ;;  %1425 = vmatpush3.bf16.msra.mxu0 %v1523_v45 }
 0x48b   :  { %v1410_v49 = vpop.f32.mrb[9].mxu1  ;;  %1426 = vmatprep.subr.bf16.mxu0 %v1792_v0  ;;  %v888_v51 = vadd.f32 %v1193_v46, %v887_v47 }
 0x48c   :  { %v890_v50 = vpop.f32.mrb[10].mxu1 }
 0x48d   :  { %v891_v52 = vadd.f32 %v1193_v46, %v890_v50  ;;  %v1411_v53 = vpop.f32.mrb[11].mxu1 }
 0x48e   :  { %1427 = vmatpush3.bf16.msra.mxu0 %v1524_v48 }
 0x48f   :  { %v894_v54 = vpack.c.bf16 %v891_v52, %v888_v51 }
 0x491   :  { %1429 = vmatmul.mubr.bf16.vlgmr.msra.gmra.mrb[12].mxu0 %v894_v54 }
 0x544   :  { %v773_v1 = vpop.f32.mrb[8].mxu0 }
 0x545   :  { %v774_v2 = vadd.f32 %v1184_v63, %v773_v1  ;;  %v1390_v3 = vpop.f32.mrb[9].mxu0 }
 0x546   :  { %v776_v4 = vpop.f32.mrb[10].mxu0 }
 0x547   :  { %780 = vst [vmem:[#allocation17] sm:$0xff] %v774_v2  ;;  %v777_v5 = vadd.f32 %v1184_v63, %v776_v4  ;;  %v1391_v6 = vpop.f32.mrb[11].mxu0 }
 0x549   :  { %781 = vst [vmem:[#allocation17 + $0x10] sm:$0xff] %v777_v5 }
 0x564   :  { %v1000_v8 = vpop.f32.mrb[12].mxu0 }
 0x565   :  { %v1430_v0 = vpop.f32.mrb[13].mxu0  ;;  %v1001_v10 = vadd.f32 %v1202_v7, %v1000_v8 }
 0x566   :  { %v1003_v9 = vpop.f32.mrb[14].mxu0 }
 0x567   :  { %v1004_v11 = vadd.f32 %v1202_v7, %v1003_v9  ;;  %v1431_v12 = vpop.f32.mrb[15].mxu0 }
 0x569   :  { %v1007_v13 = vpack.c.bf16 %v1004_v11, %v1001_v10 }
 0x56b   :  { %1449 = vmatmul.mubr.bf16.vlgmr.msra.gmra.mrb[12].mxu1 %v1007_v13 }
 0x63e   :  { %v1113_v15 = vpop.f32.mrb[12].mxu1 }
 0x63f   :  { %v1114_v16 = vadd.f32 %v1211_v14, %v1113_v15  ;;  %v1450_v17 = vpop.f32.mrb[13].mxu1 }
 0x640   :  { %v1116_v18 = vpop.f32.mrb[14].mxu1 }
 0x641   :  { %1120 = vst [vmem:[#allocation17 + $0x8] sm:$0xff] %v1114_v16  ;;  %v1117_v19 = vadd.f32 %v1211_v14, %v1116_v18  ;;  %v1451_v20 = vpop.f32.mrb[15].mxu1 }
 0x643   :  { %1121 = vst [vmem:[#allocation17 + $0x18] sm:$0xff] %v1117_v19 }
 0x644   :  { %1758 = shalt.err (!%p1755_p6)
}
 0x645   :  { %s2192_s20 = sld [smem:[#allocation26_spill]] }
 0x64b   :  { %s1759_s5 = scalar_lea.hbm %s2192_s20, 512 }
 0x64c   :  { %p1760_p7 = scmp.ne.s32.totalorder %s2192_s20, %s1759_s5  ;;  %p1763_p8 = scmp.lt.u32.totalorder %s1759_s5, %s2192_s20 }
 0x64e   :  { %p1765_p9 = pnand %p1763_p8, %p1760_p7 }
 0x650   :  { %1768 = shalt.err (!%p1765_p9)
}
 0x651   :  { %s1795_s17 = smov 256   ;;  %s1796_s28 = smov 16  }
 0x652   :  { %1133 = dma.vmem_to_hbm [thread:$0]  %s1128_s9, 512, %s2192_s20, [#allocation4], %s1795_s17, %s1795_s17, %s1796_s28  }
 0x653   :  { %1779 = dma.done.wait [#allocation4], 512  }
 0x654   :  { %1780 = vsyncadd [#allocation4], 4294966784 }
 0x655   :  { %1137 = vsyncpa [#allocation3], 1 }
 0x656   :  { %1138 = vsyncpa [#allocation6], 1 }
 0x657   :  { %1139 = vsyncpa [#allocation9], 1 }
 0x658   :  { %1140 = vsyncpa [#allocation12], 1 }
 0x659   :  { %1141 = vsyncpa [#allocation15], 1 }
 0x65a   :  { %1142 = vsyncpa [#allocation4], 1 }

</bundles_post_ra>
